<compile_context>
chip_gen: v7x
topology: tpu7x:2x2x1
jax: 0.10.0
libtpu: 0.0.40
codegen_flags: <defaults>
</compile_context>

<pallas_src>
import math
import functools

import jax
import jax.numpy as jnp
from jax.experimental import pallas as pl
from jax.experimental.pallas import tpu as pltpu

# ----------------------------- config (small synthetic BERT) -----------------------------
VOCAB = 30
MAX_POS = 16
HIDDEN = 32
HEADS = 4
HEAD_DIM = HIDDEN // HEADS
INTER = 64
LAYERS = 2
NUM_CLASSES = 2

HP = 128                     # lane-dense padded hidden width (one full vreg of lanes)
DP = HP // HEADS             # padded per-head slot: head h owns lanes [h*DP, h*DP+HEAD_DIM)
IP = 128                     # lane-dense padded FFN intermediate width
CLS_PAD = 128                # lane-dense padded classifier output width
LN_EPS = 1e-12
ATTN_SCALE = 1.0 / math.sqrt(HEAD_DIM)


def _ln_masked(x, g, b, fmask):
    """LayerNorm over the real HIDDEN features of a lane-padded (..., HP) tile.

    Padded lanes of x are zero on entry and stay zero on exit (g, b are zero there)."""
    mu = jnp.sum(x, axis=-1, keepdims=True) * (1.0 / HIDDEN)
    xc = (x - mu) * fmask
    var = jnp.sum(xc * xc, axis=-1, keepdims=True) * (1.0 / HIDDEN)
    return xc * jax.lax.rsqrt(var + LN_EPS) * g + b


# ----------------------------------- the fused kernel ------------------------------------
def _bert_forward_kernel(emb_ref, mb_ref, eg_ref, eb_ref,
                         wqkv_ref, bqkv_ref, wo_ref, bo_ref,
                         ln1g_ref, ln1b_ref, w1_ref, b1_ref, w2_ref, b2_ref,
                         ln2g_ref, ln2b_ref,
                         pw_ref, pb_ref, cw_ref, cb_ref,
                         logits_ref, h_ref, *, batch, seq):
    l = pl.program_id(0)
    rows = batch * seq

    # Validity mask over padded hidden lanes (first HIDDEN of HP are real).
    fmask = (jax.lax.broadcasted_iota(jnp.int32, (1, HP), 1) < HIDDEN).astype(jnp.float32)

    # ---- grid step 0: embedding LayerNorm (input already lane-padded) ----
    @pl.when(l == 0)
    def _():
        h_ref[...] = _ln_masked(emb_ref[...], eg_ref[...], eb_ref[...], fmask)

    x = h_ref[...]                                                     # (rows, HP) resident

    # ---- fused QKV projection: one (HP, 3*HP) MXU dot, head-padded output layout ----
    qkv = jnp.dot(x, wqkv_ref[...], preferred_element_type=jnp.float32) + bqkv_ref[...]
    q3 = qkv[:, 0 * HP:1 * HP].reshape(batch, seq, HP)
    k3 = qkv[:, 1 * HP:2 * HP].reshape(batch, seq, HP)
    v3 = qkv[:, 2 * HP:3 * HP].reshape(batch, seq, HP)

    # Additive mask bias, broadcast ONCE (hoisted out of the head loop).
    bias_b = mb_ref[...][:, None, :]                                   # (B, 1, S)

    # ---- multi-head attention: dots batched over the batch axis, per-head output
    #      projection accumulated directly (no concatenates, no per-batch unroll) ----
    attn = jnp.zeros((rows, HP), jnp.float32)
    for h in range(HEADS):                                             # 4 static iterations
        c0 = h * DP
        qh = q3[:, :, c0:c0 + DP]                                      # (B, S, DP) 32-lane slot
        kh = k3[:, :, c0:c0 + DP]
        vh = v3[:, :, c0:c0 + DP]
        s = jnp.einsum('bqd,bkd->bqk', qh, kh,
                       preferred_element_type=jnp.float32) * ATTN_SCALE + bias_b
        s = s - jnp.max(s, axis=-1, keepdims=True)
        p = jnp.exp(s)
        p = p * pl.reciprocal(jnp.sum(p, axis=-1, keepdims=True), approx=True)
        ctx = jnp.einsum('bqk,bkd->bqd', p, vh,
                         preferred_element_type=jnp.float32)           # (B, S, DP)
        attn = attn + jnp.dot(ctx.reshape(rows, DP), wo_ref[h],
                              preferred_element_type=jnp.float32)      # accumulate head slab
    attn = attn + bo_ref[...]

    # ---- residual + LayerNorm1 ----
    h1 = _ln_masked(x + attn, ln1g_ref[...], ln1b_ref[...], fmask)

    # ---- FFN (GELU) + residual + LayerNorm2 ----
    ff = jnp.dot(h1, w1_ref[...], preferred_element_type=jnp.float32) + b1_ref[...]
    ff = jax.nn.gelu(ff, approximate=True)
    ff = jnp.dot(ff, w2_ref[...], preferred_element_type=jnp.float32) + b2_ref[...]
    h_new = _ln_masked(h1 + ff, ln2g_ref[...], ln2b_ref[...], fmask)
    h_ref[...] = h_new                                                 # stays resident in VMEM

    # ---- last layer: fused pooler (tanh) + (eval dropout = identity) + padded head ----
    @pl.when(l == pl.num_programs(0) - 1)
    def _():
        cls = h_new.reshape(batch, seq, HP)[:, 0, :]                   # CLS token rows (B, HP)
        pooled = jnp.tanh(jnp.dot(cls, pw_ref[...],
                                  preferred_element_type=jnp.float32) + pb_ref[...])
        # TODO(synk): training-mode Dropout(0.1) (pltpu.prng_seed + stateful_bernoulli) not wired.
        logits_ref[...] = jnp.dot(pooled, cw_ref[...],
                                  preferred_element_type=jnp.float32) + cb_ref[...]


def bert_forward(emb, mask_bias, p, batch, seq):
    rows = batch * seq

    def const(shape):
        return pl.BlockSpec(shape, lambda l: (0,) * len(shape))

    def per_layer(shape):
        return pl.BlockSpec((None,) + shape, lambda l: (l,) + (0,) * len(shape))

    grid_spec = pltpu.PrefetchScalarGridSpec(
        num_scalar_prefetch=0,
        grid=(LAYERS,),
        in_specs=[
            const((rows, HP)),                                  # embedded input (lane-padded)
            const((batch, seq)),                                # additive attention-mask bias
            const((1, HP)), const((1, HP)),                     # embedding LayerNorm
            per_layer((HP, 3 * HP)), per_layer((1, 3 * HP)),    # fused QKV (head-padded)
            per_layer((HEADS, DP, HP)), per_layer((1, HP)),     # attn out proj (per-head slabs)
            per_layer((1, HP)), per_layer((1, HP)),             # LN1
            per_layer((HP, IP)), per_layer((1, IP)),            # FFN up
            per_layer((IP, HP)), per_layer((1, HP)),            # FFN down
            per_layer((1, HP)), per_layer((1, HP)),             # LN2
            const((HP, HP)), const((1, HP)),                    # pooler
            const((HP, CLS_PAD)), const((1, CLS_PAD)),          # classifier head (padded)
        ],
        out_specs=pl.BlockSpec((batch, CLS_PAD), lambda l: (0, 0)),
        scratch_shapes=[pltpu.VMEM((rows, HP), jnp.float32)],   # activations, resident across layers
    )
    return pl.pallas_call(
        functools.partial(_bert_forward_kernel, batch=batch, seq=seq),
        out_shape=jax.ShapeDtypeStruct((batch, CLS_PAD), jnp.float32),
        grid_spec=grid_spec,
        compiler_params=pltpu.CompilerParams(
            dimension_semantics=("arbitrary",)),                # layers are sequential
    )(emb, mask_bias, p["emb_ln_g"], p["emb_ln_b"],
      p["wqkv"], p["bqkv"], p["wo"], p["bo"],
      p["ln1_g"], p["ln1_b"], p["w1"], p["b1"], p["w2"], p["b2"],
      p["ln2_g"], p["ln2_b"],
      p["pool_w"], p["pool_b"], p["cls_w"], p["cls_b"])


# ------------------------------- params (lane-dense packing) -----------------------------
def init_params(key):
    keys = iter(jax.random.split(key, 64))

    def w(shape, scale=0.02):
        return jax.random.normal(next(keys), shape, jnp.float32) * scale

    def pad_to(a, shape):
        out = jnp.zeros(shape, jnp.float32)
        return out.at[tuple(slice(0, s) for s in a.shape)].set(a)

    def pack_qkv_weight(wm):
        # (HIDDEN, HIDDEN), head h in cols [h*HEAD_DIM:(h+1)*HEAD_DIM]
        #   -> (HP, HP) head-padded: head h occupies cols [h*DP : h*DP+HEAD_DIM].
        out = jnp.zeros((HP, HP), jnp.float32)
        for h in range(HEADS):
            out = out.at[:HIDDEN, h * DP:h * DP + HEAD_DIM].set(
                wm[:, h * HEAD_DIM:(h + 1) * HEAD_DIM])
        return out

    def pack_out_weight(wm):
        # (HIDDEN, HIDDEN), concat-head rows -> (HEADS, DP, HP) per-head slabs.
        out = jnp.zeros((HEADS, DP, HP), jnp.float32)
        for h in range(HEADS):
            out = out.at[h, :HEAD_DIM, :HIDDEN].set(wm[h * HEAD_DIM:(h + 1) * HEAD_DIM, :])
        return out

    stacks = {k: [] for k in ("wqkv", "bqkv", "wo", "bo", "ln1_g", "ln1_b",
                              "w1", "b1", "w2", "b2", "ln2_g", "ln2_b")}
    for _ in range(LAYERS):
        wq = w((HIDDEN, HIDDEN)); wk = w((HIDDEN, HIDDEN)); wv = w((HIDDEN, HIDDEN))
        stacks["wqkv"].append(jnp.concatenate(
            [pack_qkv_weight(wq), pack_qkv_weight(wk), pack_qkv_weight(wv)], axis=1))
        stacks["bqkv"].append(jnp.zeros((1, 3 * HP), jnp.float32))
        stacks["wo"].append(pack_out_weight(w((HIDDEN, HIDDEN))))
        stacks["bo"].append(jnp.zeros((1, HP), jnp.float32))
        stacks["ln1_g"].append(pad_to(jnp.ones((1, HIDDEN), jnp.float32), (1, HP)))
        stacks["ln1_b"].append(jnp.zeros((1, HP), jnp.float32))
        stacks["w1"].append(pad_to(w((HIDDEN, INTER)), (HP, IP)))
        stacks["b1"].append(jnp.zeros((1, IP), jnp.float32))
        stacks["w2"].append(pad_to(w((INTER, HIDDEN)), (IP, HP)))
        stacks["b2"].append(jnp.zeros((1, HP), jnp.float32))
        stacks["ln2_g"].append(pad_to(jnp.ones((1, HIDDEN), jnp.float32), (1, HP)))
        stacks["ln2_b"].append(jnp.zeros((1, HP), jnp.float32))

    params = {k: jnp.stack(v) for k, v in stacks.items()}
    params.update({
        "word_emb": pad_to(w((VOCAB, HIDDEN)), (VOCAB, HP)),
        "pos_emb": pad_to(w((MAX_POS, HIDDEN)), (MAX_POS, HP)),
        "type_emb": pad_to(w((2, HIDDEN)), (2, HP)),
        "emb_ln_g": pad_to(jnp.ones((1, HIDDEN), jnp.float32), (1, HP)),
        "emb_ln_b": jnp.zeros((1, HP), jnp.float32),
        "pool_w": pad_to(w((HIDDEN, HIDDEN)), (HP, HP)),
        "pool_b": jnp.zeros((1, HP), jnp.float32),
        "cls_w": pad_to(w((HIDDEN, NUM_CLASSES)), (HP, CLS_PAD)),
        "cls_b": jnp.zeros((1, CLS_PAD), jnp.float32),
    })
    return params


# -------------------------------- model (glue in plain JAX) ------------------------------
def sentiment_classifier_forward(params, input_ids, attention_mask):
    """input_ids: (B, S) int32, attention_mask: (B, S) {0,1} -> logits (B, 2)."""
    B, S = input_ids.shape
    # Additive mask bias applied in f32 inside the attention math.
    mask_bias = (1.0 - attention_mask.astype(jnp.float32)) * -10000.0     # (B, S)

    # Embedding gathers are glue; tables are lane-padded so the activation is already
    # lane-dense.  All dense math runs inside the single fused Pallas kernel.
    emb = (params["word_emb"][input_ids]
           + params["pos_emb"][jnp.arange(S)][None, :, :]
           + params["type_emb"][0][None, None, :])                        # token_type 0 only
    emb = emb.reshape(B * S, HP)

    logits_pad = bert_forward(emb, mask_bias, params, B, S)               # (B, 128)
    return logits_pad[:, :NUM_CLASSES]                                    # (B, 2)


# -------------------------------------------- main ---------------------------------------
if __name__ == "__main__":
    key = jax.random.PRNGKey(0)
    pkey, ikey = jax.random.split(key)

    params = init_params(pkey)

    B, S = 2, 8
    input_ids = jax.random.randint(ikey, (B, S), 0, VOCAB, dtype=jnp.int32)
    attention_mask = jnp.array(
        [[1, 1, 1, 1, 1, 1, 1, 1],
         [1, 1, 1, 1, 1, 0, 0, 0]], dtype=jnp.int32)

    fwd = jax.jit(sentiment_classifier_forward)
    logits = fwd(params, input_ids, attention_mask)
    logits = jax.block_until_ready(logits)

    assert logits.shape == (B, NUM_CLASSES), logits.shape
    assert logits.dtype == jnp.float32
    assert bool(jnp.all(jnp.isfinite(logits)))
    print("KERNEL_OK")
</pallas_src>

<mosaic_0001>
module attributes {stable_mosaic.version = 11 : i64} {
  func.func @_bert_forward_kernel(%arg0: i32, %arg1: memref<16x128xf32, #tpu.memory_space<vmem>>, %arg2: memref<2x8xf32, #tpu.memory_space<vmem>>, %arg3: memref<1x128xf32, #tpu.memory_space<vmem>>, %arg4: memref<1x128xf32, #tpu.memory_space<vmem>>, %arg5: memref<1x128x384xf32, #tpu.memory_space<vmem>>, %arg6: memref<1x1x384xf32, #tpu.memory_space<vmem>>, %arg7: memref<1x4x32x128xf32, #tpu.memory_space<vmem>>, %arg8: memref<1x1x128xf32, #tpu.memory_space<vmem>>, %arg9: memref<1x1x128xf32, #tpu.memory_space<vmem>>, %arg10: memref<1x1x128xf32, #tpu.memory_space<vmem>>, %arg11: memref<1x128x128xf32, #tpu.memory_space<vmem>>, %arg12: memref<1x1x128xf32, #tpu.memory_space<vmem>>, %arg13: memref<1x128x128xf32, #tpu.memory_space<vmem>>, %arg14: memref<1x1x128xf32, #tpu.memory_space<vmem>>, %arg15: memref<1x1x128xf32, #tpu.memory_space<vmem>>, %arg16: memref<1x1x128xf32, #tpu.memory_space<vmem>>, %arg17: memref<128x128xf32, #tpu.memory_space<vmem>>, %arg18: memref<1x128xf32, #tpu.memory_space<vmem>>, %arg19: memref<128x128xf32, #tpu.memory_space<vmem>>, %arg20: memref<1x128xf32, #tpu.memory_space<vmem>>, %arg21: memref<2x128xf32, #tpu.memory_space<vmem>>, %arg22: memref<16x128xf32, #tpu.memory_space<vmem>>) attributes {dimension_semantics = [#tpu.dimension_semantics<arbitrary>], iteration_bounds = array<i64: 2>, scalar_prefetch = 0 : i64, scratch_operands = 1 : i64, tpu.core_type = #tpu.core_type<tc>, window_params = [{pipeline_mode = #tpu.pipeline_mode<synchronous>, transform_indices = @transform_0, window_bounds = array<i64: 16, 128>}, {pipeline_mode = #tpu.pipeline_mode<synchronous>, transform_indices = @transform_1, window_bounds = array<i64: 2, 8>}, {pipeline_mode = #tpu.pipeline_mode<synchronous>, transform_indices = @transform_2, window_bounds = array<i64: 1, 128>}, {pipeline_mode = #tpu.pipeline_mode<synchronous>, transform_indices = @transform_3, window_bounds = array<i64: 1, 128>}, {transform_indices = @transform_4, window_bounds = array<i64: 1, 128, 384>}, {transform_indices = @transform_5, window_bounds = array<i64: 1, 1, 384>}, {transform_indices = @transform_6, window_bounds = array<i64: 1, 4, 32, 128>}, {transform_indices = @transform_7, window_bounds = array<i64: 1, 1, 128>}, {transform_indices = @transform_8, window_bounds = array<i64: 1, 1, 128>}, {transform_indices = @transform_9, window_bounds = array<i64: 1, 1, 128>}, {transform_indices = @transform_10, window_bounds = array<i64: 1, 128, 128>}, {transform_indices = @transform_11, window_bounds = array<i64: 1, 1, 128>}, {transform_indices = @transform_12, window_bounds = array<i64: 1, 128, 128>}, {transform_indices = @transform_13, window_bounds = array<i64: 1, 1, 128>}, {transform_indices = @transform_14, window_bounds = array<i64: 1, 1, 128>}, {transform_indices = @transform_15, window_bounds = array<i64: 1, 1, 128>}, {pipeline_mode = #tpu.pipeline_mode<synchronous>, transform_indices = @transform_16, window_bounds = array<i64: 128, 128>}, {pipeline_mode = #tpu.pipeline_mode<synchronous>, transform_indices = @transform_17, window_bounds = array<i64: 1, 128>}, {pipeline_mode = #tpu.pipeline_mode<synchronous>, transform_indices = @transform_18, window_bounds = array<i64: 128, 128>}, {pipeline_mode = #tpu.pipeline_mode<synchronous>, transform_indices = @transform_19, window_bounds = array<i64: 1, 128>}, {pipeline_mode = #tpu.pipeline_mode<synchronous>, transform_indices = @transform_20, window_bounds = array<i64: 2, 128>}]} {
    %0 = tpu.iota {dimensions = array<i32: 1>} : vector<1x128xi32>
    %c32_i32 = arith.constant 32 : i32
    %1 = vector.broadcast %c32_i32 : i32 to vector<1x128xi32>
    %2 = arith.cmpi slt, %0, %1 : vector<1x128xi32>
    %3 = arith.extui %2 : vector<1x128xi1> to vector<1x128xi32>
    %4 = arith.sitofp %3 : vector<1x128xi32> to vector<1x128xf32>
    %c0_i32 = arith.constant 0 : i32
    %5 = arith.cmpi eq, %arg0, %c0_i32 : i32
    %6 = arith.extui %5 : i1 to i32
    %c0_i32_0 = arith.constant 0 : i32
    %7 = arith.cmpi ne, %6, %c0_i32_0 : i32
    scf.if %7 {
      %c0_94 = arith.constant 0 : index
      %c0_95 = arith.constant 0 : index
      %210 = vector.load %arg1[%c0_94, %c0_95] : memref<16x128xf32, #tpu.memory_space<vmem>>, vector<16x128xf32>
      %c0_96 = arith.constant 0 : index
      %c0_97 = arith.constant 0 : index
      %211 = vector.load %arg3[%c0_96, %c0_97] : memref<1x128xf32, #tpu.memory_space<vmem>>, vector<1x128xf32>
      %c0_98 = arith.constant 0 : index
      %c0_99 = arith.constant 0 : index
      %212 = vector.load %arg4[%c0_98, %c0_99] : memref<1x128xf32, #tpu.memory_space<vmem>>, vector<1x128xf32>
      %cst_100 = arith.constant dense<0.000000e+00> : vector<16xf32>
      %213 = vector.multi_reduction <add>, %210, %cst_100 [1] : vector<16x128xf32> to vector<16xf32>
      %214 = vector.shape_cast %213 : vector<16xf32> to vector<16x1xf32>
      %cst_101 = arith.constant 3.125000e-02 : f32
      %215 = vector.broadcast %cst_101 : f32 to vector<16x1xf32>
      %216 = arith.mulf %214, %215 : vector<16x1xf32>
      %217 = vector.broadcast %216 : vector<16x1xf32> to vector<16x128xf32>
      %218 = arith.subf %210, %217 : vector<16x128xf32>
      %219 = vector.broadcast %4 : vector<1x128xf32> to vector<16x128xf32>
      %220 = arith.mulf %218, %219 : vector<16x128xf32>
      %221 = arith.mulf %220, %220 : vector<16x128xf32>
      %cst_102 = arith.constant dense<0.000000e+00> : vector<16xf32>
      %222 = vector.multi_reduction <add>, %221, %cst_102 [1] : vector<16x128xf32> to vector<16xf32>
      %223 = vector.shape_cast %222 : vector<16xf32> to vector<16x1xf32>
      %cst_103 = arith.constant 3.125000e-02 : f32
      %224 = vector.broadcast %cst_103 : f32 to vector<16x1xf32>
      %225 = arith.mulf %223, %224 : vector<16x1xf32>
      %cst_104 = arith.constant 9.99999996E-13 : f32
      %226 = vector.broadcast %cst_104 : f32 to vector<16x1xf32>
      %227 = arith.addf %225, %226 : vector<16x1xf32>
      %228 = math.rsqrt %227 : vector<16x1xf32>
      %229 = vector.broadcast %228 : vector<16x1xf32> to vector<16x128xf32>
      %230 = arith.mulf %220, %229 : vector<16x128xf32>
      %231 = vector.broadcast %211 : vector<1x128xf32> to vector<16x128xf32>
      %232 = arith.mulf %230, %231 : vector<16x128xf32>
      %233 = vector.broadcast %212 : vector<1x128xf32> to vector<16x128xf32>
      %234 = arith.addf %232, %233 : vector<16x128xf32>
      %c0_105 = arith.constant 0 : index
      %c0_106 = arith.constant 0 : index
      %235 = vector.load %arg22[%c0_105, %c0_106] : memref<16x128xf32, #tpu.memory_space<vmem>>, vector<16x128xf32>
      tpu.vector_store %arg22[%c0_105, %c0_106], %234 {strides = array<i32>} : memref<16x128xf32, #tpu.memory_space<vmem>>, vector<16x128xf32>,
    } else {
    }
    %c0 = arith.constant 0 : index
    %c0_1 = arith.constant 0 : index
    %8 = vector.load %arg22[%c0, %c0_1] : memref<16x128xf32, #tpu.memory_space<vmem>>, vector<16x128xf32>
    %c0_2 = arith.constant 0 : index
    %c0_3 = arith.constant 0 : index
    %c0_4 = arith.constant 0 : index
    %9 = vector.load %arg5[%c0_2, %c0_3, %c0_4] : memref<1x128x384xf32, #tpu.memory_space<vmem>>, vector<1x128x384xf32>
    %10 = vector.shape_cast %9 : vector<1x128x384xf32> to vector<128x384xf32>
    %cst = arith.constant dense<0.000000e+00> : vector<16x384xf32>
    %11 = tpu.matmul %8, %10, %cst {dimension_numbers = #tpu.dot_dimension_numbers<[1], [0], [0], [1], [0, 0, 1, 1], [], []>} : vector<16x128xf32>, vector<128x384xf32>, vector<16x384xf32> -> vector<16x384xf32>
    %c0_5 = arith.constant 0 : index
    %c0_6 = arith.constant 0 : index
    %c0_7 = arith.constant 0 : index
    %12 = vector.load %arg6[%c0_5, %c0_6, %c0_7] : memref<1x1x384xf32, #tpu.memory_space<vmem>>, vector<1x1x384xf32>
    %13 = vector.shape_cast %12 : vector<1x1x384xf32> to vector<1x384xf32>
    %14 = vector.broadcast %13 : vector<1x384xf32> to vector<16x384xf32>
    %15 = arith.addf %11, %14 : vector<16x384xf32>
    %16 = vector.extract_strided_slice %15 {offsets = [0, 0], sizes = [16, 128], strides = [1, 1]} : vector<16x384xf32> to vector<16x128xf32>
    %17 = vector.shape_cast %16 : vector<16x128xf32> to vector<2x8x128xf32>
    %18 = vector.extract_strided_slice %15 {offsets = [0, 128], sizes = [16, 128], strides = [1, 1]} : vector<16x384xf32> to vector<16x128xf32>
    %19 = vector.shape_cast %18 : vector<16x128xf32> to vector<2x8x128xf32>
    %20 = vector.extract_strided_slice %15 {offsets = [0, 256], sizes = [16, 128], strides = [1, 1]} : vector<16x384xf32> to vector<16x128xf32>
    %21 = vector.shape_cast %20 : vector<16x128xf32> to vector<2x8x128xf32>
    %c0_8 = arith.constant 0 : index
    %c0_9 = arith.constant 0 : index
    %22 = vector.load %arg2[%c0_8, %c0_9] : memref<2x8xf32, #tpu.memory_space<vmem>>, vector<2x8xf32>
    %23 = vector.shape_cast %22 : vector<2x8xf32> to vector<2x1x8xf32>
    %cst_10 = arith.constant 0.000000e+00 : f32
    %24 = vector.broadcast %cst_10 : f32 to vector<16x128xf32>
    %25 = vector.extract_strided_slice %17 {offsets = [0, 0, 0], sizes = [2, 8, 32], strides = [1, 1, 1]} : vector<2x8x128xf32> to vector<2x8x32xf32>
    %26 = vector.extract_strided_slice %19 {offsets = [0, 0, 0], sizes = [2, 8, 32], strides = [1, 1, 1]} : vector<2x8x128xf32> to vector<2x8x32xf32>
    %27 = vector.extract_strided_slice %21 {offsets = [0, 0, 0], sizes = [2, 8, 32], strides = [1, 1, 1]} : vector<2x8x128xf32> to vector<2x8x32xf32>
    "tpu.trace_start"() <{level = 10 : i32, message = "bqd,bkd->bqk"}> : () -> ()
    %cst_11 = arith.constant dense<0.000000e+00> : vector<2x8x8xf32>
    %28 = tpu.matmul %25, %26, %cst_11 {dimension_numbers = #tpu.dot_dimension_numbers<[2], [2], [1], [1], [0, 0, 0, 1, 1, 1], [0], [0]>} : vector<2x8x32xf32>, vector<2x8x32xf32>, vector<2x8x8xf32> -> vector<2x8x8xf32>
    "tpu.trace_stop"() : () -> ()
    %cst_12 = arith.constant 0.353553385 : f32
    %29 = vector.broadcast %cst_12 : f32 to vector<2x8x8xf32>
    %30 = arith.mulf %28, %29 : vector<2x8x8xf32>
    %31 = vector.broadcast %23 : vector<2x1x8xf32> to vector<2x8x8xf32>
    %32 = arith.addf %30, %31 : vector<2x8x8xf32>
    %cst_13 = arith.constant dense<0xFF800000> : vector<2x8xf32>
    %33 = vector.multi_reduction <maximumf>, %32, %cst_13 [2] : vector<2x8x8xf32> to vector<2x8xf32>
    %34 = vector.shape_cast %33 : vector<2x8xf32> to vector<2x8x1xf32>
    %35 = vector.broadcast %34 : vector<2x8x1xf32> to vector<2x8x8xf32>
    %36 = arith.subf %32, %35 : vector<2x8x8xf32>
    %37 = math.exp %36 : vector<2x8x8xf32>
    %cst_14 = arith.constant dense<0.000000e+00> : vector<2x8xf32>
    %38 = vector.multi_reduction <add>, %37, %cst_14 [2] : vector<2x8x8xf32> to vector<2x8xf32>
    %39 = vector.shape_cast %38 : vector<2x8xf32> to vector<2x8x1xf32>
    %40 = tpu.reciprocal %39 {approx = true} : vector<2x8x1xf32> -> vector<2x8x1xf32>
    %41 = vector.broadcast %40 : vector<2x8x1xf32> to vector<2x8x8xf32>
    %42 = arith.mulf %37, %41 : vector<2x8x8xf32>
    "tpu.trace_start"() <{level = 10 : i32, message = "bqk,bkd->bqd"}> : () -> ()
    %cst_15 = arith.constant dense<0.000000e+00> : vector<2x8x32xf32>
    %43 = tpu.matmul %42, %27, %cst_15 {dimension_numbers = #tpu.dot_dimension_numbers<[2], [1], [1], [2], [0, 0, 0, 1, 1, 2], [0], [0]>} : vector<2x8x8xf32>, vector<2x8x32xf32>, vector<2x8x32xf32> -> vector<2x8x32xf32>
    "tpu.trace_stop"() : () -> ()
    %44 = vector.shape_cast %43 : vector<2x8x32xf32> to vector<16x32xf32>
    %c0_16 = arith.constant 0 : index
    %c0_17 = arith.constant 0 : index
    %c0_18 = arith.constant 0 : index
    %c0_19 = arith.constant 0 : index
    %45 = vector.load %arg7[%c0_16, %c0_17, %c0_18, %c0_19] : memref<1x4x32x128xf32, #tpu.memory_space<vmem>>, vector<1x1x32x128xf32>
    %46 = vector.shape_cast %45 : vector<1x1x32x128xf32> to vector<32x128xf32>
    %cst_20 = arith.constant dense<0.000000e+00> : vector<16x128xf32>
    %47 = tpu.matmul %44, %46, %cst_20 {dimension_numbers = #tpu.dot_dimension_numbers<[1], [0], [0], [1], [0, 0, 1, 1], [], []>} : vector<16x32xf32>, vector<32x128xf32>, vector<16x128xf32> -> vector<16x128xf32>
    %48 = arith.addf %24, %47 : vector<16x128xf32>
    %49 = vector.extract_strided_slice %17 {offsets = [0, 0, 32], sizes = [2, 8, 32], strides = [1, 1, 1]} : vector<2x8x128xf32> to vector<2x8x32xf32>
    %50 = vector.extract_strided_slice %19 {offsets = [0, 0, 32], sizes = [2, 8, 32], strides = [1, 1, 1]} : vector<2x8x128xf32> to vector<2x8x32xf32>
    %51 = vector.extract_strided_slice %21 {offsets = [0, 0, 32], sizes = [2, 8, 32], strides = [1, 1, 1]} : vector<2x8x128xf32> to vector<2x8x32xf32>
    "tpu.trace_start"() <{level = 10 : i32, message = "bqd,bkd->bqk"}> : () -> ()
    %cst_21 = arith.constant dense<0.000000e+00> : vector<2x8x8xf32>
    %52 = tpu.matmul %49, %50, %cst_21 {dimension_numbers = #tpu.dot_dimension_numbers<[2], [2], [1], [1], [0, 0, 0, 1, 1, 1], [0], [0]>} : vector<2x8x32xf32>, vector<2x8x32xf32>, vector<2x8x8xf32> -> vector<2x8x8xf32>
    "tpu.trace_stop"() : () -> ()
    %cst_22 = arith.constant 0.353553385 : f32
    %53 = vector.broadcast %cst_22 : f32 to vector<2x8x8xf32>
    %54 = arith.mulf %52, %53 : vector<2x8x8xf32>
    %55 = vector.broadcast %23 : vector<2x1x8xf32> to vector<2x8x8xf32>
    %56 = arith.addf %54, %55 : vector<2x8x8xf32>
    %cst_23 = arith.constant dense<0xFF800000> : vector<2x8xf32>
    %57 = vector.multi_reduction <maximumf>, %56, %cst_23 [2] : vector<2x8x8xf32> to vector<2x8xf32>
    %58 = vector.shape_cast %57 : vector<2x8xf32> to vector<2x8x1xf32>
    %59 = vector.broadcast %58 : vector<2x8x1xf32> to vector<2x8x8xf32>
    %60 = arith.subf %56, %59 : vector<2x8x8xf32>
    %61 = math.exp %60 : vector<2x8x8xf32>
    %cst_24 = arith.constant dense<0.000000e+00> : vector<2x8xf32>
    %62 = vector.multi_reduction <add>, %61, %cst_24 [2] : vector<2x8x8xf32> to vector<2x8xf32>
    %63 = vector.shape_cast %62 : vector<2x8xf32> to vector<2x8x1xf32>
    %64 = tpu.reciprocal %63 {approx = true} : vector<2x8x1xf32> -> vector<2x8x1xf32>
    %65 = vector.broadcast %64 : vector<2x8x1xf32> to vector<2x8x8xf32>
    %66 = arith.mulf %61, %65 : vector<2x8x8xf32>
    "tpu.trace_start"() <{level = 10 : i32, message = "bqk,bkd->bqd"}> : () -> ()
    %cst_25 = arith.constant dense<0.000000e+00> : vector<2x8x32xf32>
    %67 = tpu.matmul %66, %51, %cst_25 {dimension_numbers = #tpu.dot_dimension_numbers<[2], [1], [1], [2], [0, 0, 0, 1, 1, 2], [0], [0]>} : vector<2x8x8xf32>, vector<2x8x32xf32>, vector<2x8x32xf32> -> vector<2x8x32xf32>
    "tpu.trace_stop"() : () -> ()
    %68 = vector.shape_cast %67 : vector<2x8x32xf32> to vector<16x32xf32>
    %c0_26 = arith.constant 0 : index
    %c1 = arith.constant 1 : index
    %c0_27 = arith.constant 0 : index
    %c0_28 = arith.constant 0 : index
    %69 = vector.load %arg7[%c0_26, %c1, %c0_27, %c0_28] : memref<1x4x32x128xf32, #tpu.memory_space<vmem>>, vector<1x1x32x128xf32>
    %70 = vector.shape_cast %69 : vector<1x1x32x128xf32> to vector<32x128xf32>
    %cst_29 = arith.constant dense<0.000000e+00> : vector<16x128xf32>
    %71 = tpu.matmul %68, %70, %cst_29 {dimension_numbers = #tpu.dot_dimension_numbers<[1], [0], [0], [1], [0, 0, 1, 1], [], []>} : vector<16x32xf32>, vector<32x128xf32>, vector<16x128xf32> -> vector<16x128xf32>
    %72 = arith.addf %48, %71 : vector<16x128xf32>
    %73 = vector.extract_strided_slice %17 {offsets = [0, 0, 64], sizes = [2, 8, 32], strides = [1, 1, 1]} : vector<2x8x128xf32> to vector<2x8x32xf32>
    %74 = vector.extract_strided_slice %19 {offsets = [0, 0, 64], sizes = [2, 8, 32], strides = [1, 1, 1]} : vector<2x8x128xf32> to vector<2x8x32xf32>
    %75 = vector.extract_strided_slice %21 {offsets = [0, 0, 64], sizes = [2, 8, 32], strides = [1, 1, 1]} : vector<2x8x128xf32> to vector<2x8x32xf32>
    "tpu.trace_start"() <{level = 10 : i32, message = "bqd,bkd->bqk"}> : () -> ()
    %cst_30 = arith.constant dense<0.000000e+00> : vector<2x8x8xf32>
    %76 = tpu.matmul %73, %74, %cst_30 {dimension_numbers = #tpu.dot_dimension_numbers<[2], [2], [1], [1], [0, 0, 0, 1, 1, 1], [0], [0]>} : vector<2x8x32xf32>, vector<2x8x32xf32>, vector<2x8x8xf32> -> vector<2x8x8xf32>
    "tpu.trace_stop"() : () -> ()
    %cst_31 = arith.constant 0.353553385 : f32
    %77 = vector.broadcast %cst_31 : f32 to vector<2x8x8xf32>
    %78 = arith.mulf %76, %77 : vector<2x8x8xf32>
    %79 = vector.broadcast %23 : vector<2x1x8xf32> to vector<2x8x8xf32>
    %80 = arith.addf %78, %79 : vector<2x8x8xf32>
    %cst_32 = arith.constant dense<0xFF800000> : vector<2x8xf32>
    %81 = vector.multi_reduction <maximumf>, %80, %cst_32 [2] : vector<2x8x8xf32> to vector<2x8xf32>
    %82 = vector.shape_cast %81 : vector<2x8xf32> to vector<2x8x1xf32>
    %83 = vector.broadcast %82 : vector<2x8x1xf32> to vector<2x8x8xf32>
    %84 = arith.subf %80, %83 : vector<2x8x8xf32>
    %85 = math.exp %84 : vector<2x8x8xf32>
    %cst_33 = arith.constant dense<0.000000e+00> : vector<2x8xf32>
    %86 = vector.multi_reduction <add>, %85, %cst_33 [2] : vector<2x8x8xf32> to vector<2x8xf32>
    %87 = vector.shape_cast %86 : vector<2x8xf32> to vector<2x8x1xf32>
    %88 = tpu.reciprocal %87 {approx = true} : vector<2x8x1xf32> -> vector<2x8x1xf32>
    %89 = vector.broadcast %88 : vector<2x8x1xf32> to vector<2x8x8xf32>
    %90 = arith.mulf %85, %89 : vector<2x8x8xf32>
    "tpu.trace_start"() <{level = 10 : i32, message = "bqk,bkd->bqd"}> : () -> ()
    %cst_34 = arith.constant dense<0.000000e+00> : vector<2x8x32xf32>
    %91 = tpu.matmul %90, %75, %cst_34 {dimension_numbers = #tpu.dot_dimension_numbers<[2], [1], [1], [2], [0, 0, 0, 1, 1, 2], [0], [0]>} : vector<2x8x8xf32>, vector<2x8x32xf32>, vector<2x8x32xf32> -> vector<2x8x32xf32>
    "tpu.trace_stop"() : () -> ()
    %92 = vector.shape_cast %91 : vector<2x8x32xf32> to vector<16x32xf32>
    %c0_35 = arith.constant 0 : index
    %c2 = arith.constant 2 : index
    %c0_36 = arith.constant 0 : index
    %c0_37 = arith.constant 0 : index
    %93 = vector.load %arg7[%c0_35, %c2, %c0_36, %c0_37] : memref<1x4x32x128xf32, #tpu.memory_space<vmem>>, vector<1x1x32x128xf32>
    %94 = vector.shape_cast %93 : vector<1x1x32x128xf32> to vector<32x128xf32>
    %cst_38 = arith.constant dense<0.000000e+00> : vector<16x128xf32>
    %95 = tpu.matmul %92, %94, %cst_38 {dimension_numbers = #tpu.dot_dimension_numbers<[1], [0], [0], [1], [0, 0, 1, 1], [], []>} : vector<16x32xf32>, vector<32x128xf32>, vector<16x128xf32> -> vector<16x128xf32>
    %96 = arith.addf %72, %95 : vector<16x128xf32>
    %97 = vector.extract_strided_slice %17 {offsets = [0, 0, 96], sizes = [2, 8, 32], strides = [1, 1, 1]} : vector<2x8x128xf32> to vector<2x8x32xf32>
    %98 = vector.extract_strided_slice %19 {offsets = [0, 0, 96], sizes = [2, 8, 32], strides = [1, 1, 1]} : vector<2x8x128xf32> to vector<2x8x32xf32>
    %99 = vector.extract_strided_slice %21 {offsets = [0, 0, 96], sizes = [2, 8, 32], strides = [1, 1, 1]} : vector<2x8x128xf32> to vector<2x8x32xf32>
    "tpu.trace_start"() <{level = 10 : i32, message = "bqd,bkd->bqk"}> : () -> ()
    %cst_39 = arith.constant dense<0.000000e+00> : vector<2x8x8xf32>
    %100 = tpu.matmul %97, %98, %cst_39 {dimension_numbers = #tpu.dot_dimension_numbers<[2], [2], [1], [1], [0, 0, 0, 1, 1, 1], [0], [0]>} : vector<2x8x32xf32>, vector<2x8x32xf32>, vector<2x8x8xf32> -> vector<2x8x8xf32>
    "tpu.trace_stop"() : () -> ()
    %cst_40 = arith.constant 0.353553385 : f32
    %101 = vector.broadcast %cst_40 : f32 to vector<2x8x8xf32>
    %102 = arith.mulf %100, %101 : vector<2x8x8xf32>
    %103 = vector.broadcast %23 : vector<2x1x8xf32> to vector<2x8x8xf32>
    %104 = arith.addf %102, %103 : vector<2x8x8xf32>
    %cst_41 = arith.constant dense<0xFF800000> : vector<2x8xf32>
    %105 = vector.multi_reduction <maximumf>, %104, %cst_41 [2] : vector<2x8x8xf32> to vector<2x8xf32>
    %106 = vector.shape_cast %105 : vector<2x8xf32> to vector<2x8x1xf32>
    %107 = vector.broadcast %106 : vector<2x8x1xf32> to vector<2x8x8xf32>
    %108 = arith.subf %104, %107 : vector<2x8x8xf32>
    %109 = math.exp %108 : vector<2x8x8xf32>
    %cst_42 = arith.constant dense<0.000000e+00> : vector<2x8xf32>
    %110 = vector.multi_reduction <add>, %109, %cst_42 [2] : vector<2x8x8xf32> to vector<2x8xf32>
    %111 = vector.shape_cast %110 : vector<2x8xf32> to vector<2x8x1xf32>
    %112 = tpu.reciprocal %111 {approx = true} : vector<2x8x1xf32> -> vector<2x8x1xf32>
    %113 = vector.broadcast %112 : vector<2x8x1xf32> to vector<2x8x8xf32>
    %114 = arith.mulf %109, %113 : vector<2x8x8xf32>
    "tpu.trace_start"() <{level = 10 : i32, message = "bqk,bkd->bqd"}> : () -> ()
    %cst_43 = arith.constant dense<0.000000e+00> : vector<2x8x32xf32>
    %115 = tpu.matmul %114, %99, %cst_43 {dimension_numbers = #tpu.dot_dimension_numbers<[2], [1], [1], [2], [0, 0, 0, 1, 1, 2], [0], [0]>} : vector<2x8x8xf32>, vector<2x8x32xf32>, vector<2x8x32xf32> -> vector<2x8x32xf32>
    "tpu.trace_stop"() : () -> ()
    %116 = vector.shape_cast %115 : vector<2x8x32xf32> to vector<16x32xf32>
    %c0_44 = arith.constant 0 : index
    %c3 = arith.constant 3 : index
    %c0_45 = arith.constant 0 : index
    %c0_46 = arith.constant 0 : index
    %117 = vector.load %arg7[%c0_44, %c3, %c0_45, %c0_46] : memref<1x4x32x128xf32, #tpu.memory_space<vmem>>, vector<1x1x32x128xf32>
    %118 = vector.shape_cast %117 : vector<1x1x32x128xf32> to vector<32x128xf32>
    %cst_47 = arith.constant dense<0.000000e+00> : vector<16x128xf32>
    %119 = tpu.matmul %116, %118, %cst_47 {dimension_numbers = #tpu.dot_dimension_numbers<[1], [0], [0], [1], [0, 0, 1, 1], [], []>} : vector<16x32xf32>, vector<32x128xf32>, vector<16x128xf32> -> vector<16x128xf32>
    %120 = arith.addf %96, %119 : vector<16x128xf32>
    %c0_48 = arith.constant 0 : index
    %c0_49 = arith.constant 0 : index
    %c0_50 = arith.constant 0 : index
    %121 = vector.load %arg8[%c0_48, %c0_49, %c0_50] : memref<1x1x128xf32, #tpu.memory_space<vmem>>, vector<1x1x128xf32>
    %122 = vector.shape_cast %121 : vector<1x1x128xf32> to vector<1x128xf32>
    %123 = vector.broadcast %122 : vector<1x128xf32> to vector<16x128xf32>
    %124 = arith.addf %120, %123 : vector<16x128xf32>
    %125 = arith.addf %8, %124 : vector<16x128xf32>
    %c0_51 = arith.constant 0 : index
    %c0_52 = arith.constant 0 : index
    %c0_53 = arith.constant 0 : index
    %126 = vector.load %arg9[%c0_51, %c0_52, %c0_53] : memref<1x1x128xf32, #tpu.memory_space<vmem>>, vector<1x1x128xf32>
    %127 = vector.shape_cast %126 : vector<1x1x128xf32> to vector<1x128xf32>
    %c0_54 = arith.constant 0 : index
    %c0_55 = arith.constant 0 : index
    %c0_56 = arith.constant 0 : index
    %128 = vector.load %arg10[%c0_54, %c0_55, %c0_56] : memref<1x1x128xf32, #tpu.memory_space<vmem>>, vector<1x1x128xf32>
    %129 = vector.shape_cast %128 : vector<1x1x128xf32> to vector<1x128xf32>
    %cst_57 = arith.constant dense<0.000000e+00> : vector<16xf32>
    %130 = vector.multi_reduction <add>, %125, %cst_57 [1] : vector<16x128xf32> to vector<16xf32>
    %131 = vector.shape_cast %130 : vector<16xf32> to vector<16x1xf32>
    %cst_58 = arith.constant 3.125000e-02 : f32
    %132 = vector.broadcast %cst_58 : f32 to vector<16x1xf32>
    %133 = arith.mulf %131, %132 : vector<16x1xf32>
    %134 = vector.broadcast %133 : vector<16x1xf32> to vector<16x128xf32>
    %135 = arith.subf %125, %134 : vector<16x128xf32>
    %136 = vector.broadcast %4 : vector<1x128xf32> to vector<16x128xf32>
    %137 = arith.mulf %135, %136 : vector<16x128xf32>
    %138 = arith.mulf %137, %137 : vector<16x128xf32>
    %cst_59 = arith.constant dense<0.000000e+00> : vector<16xf32>
    %139 = vector.multi_reduction <add>, %138, %cst_59 [1] : vector<16x128xf32> to vector<16xf32>
    %140 = vector.shape_cast %139 : vector<16xf32> to vector<16x1xf32>
    %cst_60 = arith.constant 3.125000e-02 : f32
    %141 = vector.broadcast %cst_60 : f32 to vector<16x1xf32>
    %142 = arith.mulf %140, %141 : vector<16x1xf32>
    %cst_61 = arith.constant 9.99999996E-13 : f32
    %143 = vector.broadcast %cst_61 : f32 to vector<16x1xf32>
    %144 = arith.addf %142, %143 : vector<16x1xf32>
    %145 = math.rsqrt %144 : vector<16x1xf32>
    %146 = vector.broadcast %145 : vector<16x1xf32> to vector<16x128xf32>
    %147 = arith.mulf %137, %146 : vector<16x128xf32>
    %148 = vector.broadcast %127 : vector<1x128xf32> to vector<16x128xf32>
    %149 = arith.mulf %147, %148 : vector<16x128xf32>
    %150 = vector.broadcast %129 : vector<1x128xf32> to vector<16x128xf32>
    %151 = arith.addf %149, %150 : vector<16x128xf32>
    %c0_62 = arith.constant 0 : index
    %c0_63 = arith.constant 0 : index
    %c0_64 = arith.constant 0 : index
    %152 = vector.load %arg11[%c0_62, %c0_63, %c0_64] : memref<1x128x128xf32, #tpu.memory_space<vmem>>, vector<1x128x128xf32>
    %153 = vector.shape_cast %152 : vector<1x128x128xf32> to vector<128x128xf32>
    %cst_65 = arith.constant dense<0.000000e+00> : vector<16x128xf32>
    %154 = tpu.matmul %151, %153, %cst_65 {dimension_numbers = #tpu.dot_dimension_numbers<[1], [0], [0], [1], [0, 0, 1, 1], [], []>} : vector<16x128xf32>, vector<128x128xf32>, vector<16x128xf32> -> vector<16x128xf32>
    %c0_66 = arith.constant 0 : index
    %c0_67 = arith.constant 0 : index
    %c0_68 = arith.constant 0 : index
    %155 = vector.load %arg12[%c0_66, %c0_67, %c0_68] : memref<1x1x128xf32, #tpu.memory_space<vmem>>, vector<1x1x128xf32>
    %156 = vector.shape_cast %155 : vector<1x1x128xf32> to vector<1x128xf32>
    %157 = vector.broadcast %156 : vector<1x128xf32> to vector<16x128xf32>
    %158 = arith.addf %154, %157 : vector<16x128xf32>
    %159 = arith.mulf %158, %158 : vector<16x128xf32>
    %160 = arith.mulf %158, %159 : vector<16x128xf32>
    %cst_69 = arith.constant 4.471500e-02 : f32
    %161 = vector.broadcast %cst_69 : f32 to vector<16x128xf32>
    %162 = arith.mulf %161, %160 : vector<16x128xf32>
    %163 = arith.addf %158, %162 : vector<16x128xf32>
    %cst_70 = arith.constant 0.797884583 : f32
    %164 = vector.broadcast %cst_70 : f32 to vector<16x128xf32>
    %165 = arith.mulf %164, %163 : vector<16x128xf32>
    %166 = math.tanh %165 : vector<16x128xf32>
    %cst_71 = arith.constant 1.000000e+00 : f32
    %167 = vector.broadcast %cst_71 : f32 to vector<16x128xf32>
    %168 = arith.addf %167, %166 : vector<16x128xf32>
    %cst_72 = arith.constant 5.000000e-01 : f32
    %169 = vector.broadcast %cst_72 : f32 to vector<16x128xf32>
    %170 = arith.mulf %169, %168 : vector<16x128xf32>
    %171 = arith.mulf %158, %170 : vector<16x128xf32>
    %c0_73 = arith.constant 0 : index
    %c0_74 = arith.constant 0 : index
    %c0_75 = arith.constant 0 : index
    %172 = vector.load %arg13[%c0_73, %c0_74, %c0_75] : memref<1x128x128xf32, #tpu.memory_space<vmem>>, vector<1x128x128xf32>
    %173 = vector.shape_cast %172 : vector<1x128x128xf32> to vector<128x128xf32>
    %cst_76 = arith.constant dense<0.000000e+00> : vector<16x128xf32>
    %174 = tpu.matmul %171, %173, %cst_76 {dimension_numbers = #tpu.dot_dimension_numbers<[1], [0], [0], [1], [0, 0, 1, 1], [], []>} : vector<16x128xf32>, vector<128x128xf32>, vector<16x128xf32> -> vector<16x128xf32>
    %c0_77 = arith.constant 0 : index
    %c0_78 = arith.constant 0 : index
    %c0_79 = arith.constant 0 : index
    %175 = vector.load %arg14[%c0_77, %c0_78, %c0_79] : memref<1x1x128xf32, #tpu.memory_space<vmem>>, vector<1x1x128xf32>
    %176 = vector.shape_cast %175 : vector<1x1x128xf32> to vector<1x128xf32>
    %177 = vector.broadcast %176 : vector<1x128xf32> to vector<16x128xf32>
    %178 = arith.addf %174, %177 : vector<16x128xf32>
    %179 = arith.addf %151, %178 : vector<16x128xf32>
    %c0_80 = arith.constant 0 : index
    %c0_81 = arith.constant 0 : index
    %c0_82 = arith.constant 0 : index
    %180 = vector.load %arg15[%c0_80, %c0_81, %c0_82] : memref<1x1x128xf32, #tpu.memory_space<vmem>>, vector<1x1x128xf32>
    %181 = vector.shape_cast %180 : vector<1x1x128xf32> to vector<1x128xf32>
    %c0_83 = arith.constant 0 : index
    %c0_84 = arith.constant 0 : index
    %c0_85 = arith.constant 0 : index
    %182 = vector.load %arg16[%c0_83, %c0_84, %c0_85] : memref<1x1x128xf32, #tpu.memory_space<vmem>>, vector<1x1x128xf32>
    %183 = vector.shape_cast %182 : vector<1x1x128xf32> to vector<1x128xf32>
    %cst_86 = arith.constant dense<0.000000e+00> : vector<16xf32>
    %184 = vector.multi_reduction <add>, %179, %cst_86 [1] : vector<16x128xf32> to vector<16xf32>
    %185 = vector.shape_cast %184 : vector<16xf32> to vector<16x1xf32>
    %cst_87 = arith.constant 3.125000e-02 : f32
    %186 = vector.broadcast %cst_87 : f32 to vector<16x1xf32>
    %187 = arith.mulf %185, %186 : vector<16x1xf32>
    %188 = vector.broadcast %187 : vector<16x1xf32> to vector<16x128xf32>
    %189 = arith.subf %179, %188 : vector<16x128xf32>
    %190 = vector.broadcast %4 : vector<1x128xf32> to vector<16x128xf32>
    %191 = arith.mulf %189, %190 : vector<16x128xf32>
    %192 = arith.mulf %191, %191 : vector<16x128xf32>
    %cst_88 = arith.constant dense<0.000000e+00> : vector<16xf32>
    %193 = vector.multi_reduction <add>, %192, %cst_88 [1] : vector<16x128xf32> to vector<16xf32>
    %194 = vector.shape_cast %193 : vector<16xf32> to vector<16x1xf32>
    %cst_89 = arith.constant 3.125000e-02 : f32
    %195 = vector.broadcast %cst_89 : f32 to vector<16x1xf32>
    %196 = arith.mulf %194, %195 : vector<16x1xf32>
    %cst_90 = arith.constant 9.99999996E-13 : f32
    %197 = vector.broadcast %cst_90 : f32 to vector<16x1xf32>
    %198 = arith.addf %196, %197 : vector<16x1xf32>
    %199 = math.rsqrt %198 : vector<16x1xf32>
    %200 = vector.broadcast %199 : vector<16x1xf32> to vector<16x128xf32>
    %201 = arith.mulf %191, %200 : vector<16x128xf32>
    %202 = vector.broadcast %181 : vector<1x128xf32> to vector<16x128xf32>
    %203 = arith.mulf %201, %202 : vector<16x128xf32>
    %204 = vector.broadcast %183 : vector<1x128xf32> to vector<16x128xf32>
    %205 = arith.addf %203, %204 : vector<16x128xf32>
    %c0_91 = arith.constant 0 : index
    %c0_92 = arith.constant 0 : index
    %206 = vector.load %arg22[%c0_91, %c0_92] : memref<16x128xf32, #tpu.memory_space<vmem>>, vector<16x128xf32>
    tpu.vector_store %arg22[%c0_91, %c0_92], %205 {strides = array<i32>} : memref<16x128xf32, #tpu.memory_space<vmem>>, vector<16x128xf32>,
    %c1_i32 = arith.constant 1 : i32
    %207 = arith.cmpi eq, %arg0, %c1_i32 : i32
    %208 = arith.extui %207 : i1 to i32
    %c0_i32_93 = arith.constant 0 : i32
    %209 = arith.cmpi ne, %208, %c0_i32_93 : i32
    scf.if %209 {
      %210 = vector.shape_cast %205 : vector<16x128xf32> to vector<2x8x128xf32>
      %211 = vector.extract_strided_slice %210 {offsets = [0, 0, 0], sizes = [2, 1, 128], strides = [1, 1, 1]} : vector<2x8x128xf32> to vector<2x1x128xf32>
      %212 = vector.shape_cast %211 : vector<2x1x128xf32> to vector<2x128xf32>
      %c0_94 = arith.constant 0 : index
      %c0_95 = arith.constant 0 : index
      %213 = vector.load %arg17[%c0_94, %c0_95] : memref<128x128xf32, #tpu.memory_space<vmem>>, vector<128x128xf32>
      %cst_96 = arith.constant dense<0.000000e+00> : vector<2x128xf32>
      %214 = tpu.matmul %212, %213, %cst_96 {dimension_numbers = #tpu.dot_dimension_numbers<[1], [0], [0], [1], [0, 0, 1, 1], [], []>} : vector<2x128xf32>, vector<128x128xf32>, vector<2x128xf32> -> vector<2x128xf32>
      %c0_97 = arith.constant 0 : index
      %c0_98 = arith.constant 0 : index
      %215 = vector.load %arg18[%c0_97, %c0_98] : memref<1x128xf32, #tpu.memory_space<vmem>>, vector<1x128xf32>
      %216 = vector.broadcast %215 : vector<1x128xf32> to vector<2x128xf32>
      %217 = arith.addf %214, %216 : vector<2x128xf32>
      %218 = math.tanh %217 : vector<2x128xf32>
      %c0_99 = arith.constant 0 : index
      %c0_100 = arith.constant 0 : index
      %219 = vector.load %arg19[%c0_99, %c0_100] : memref<128x128xf32, #tpu.memory_space<vmem>>, vector<128x128xf32>
      %cst_101 = arith.constant dense<0.000000e+00> : vector<2x128xf32>
      %220 = tpu.matmul %218, %219, %cst_101 {dimension_numbers = #tpu.dot_dimension_numbers<[1], [0], [0], [1], [0, 0, 1, 1], [], []>} : vector<2x128xf32>, vector<128x128xf32>, vector<2x128xf32> -> vector<2x128xf32>
      %c0_102 = arith.constant 0 : index
      %c0_103 = arith.constant 0 : index
      %221 = vector.load %arg20[%c0_102, %c0_103] : memref<1x128xf32, #tpu.memory_space<vmem>>, vector<1x128xf32>
      %222 = vector.broadcast %221 : vector<1x128xf32> to vector<2x128xf32>
      %223 = arith.addf %220, %222 : vector<2x128xf32>
      %c0_104 = arith.constant 0 : index
      %c0_105 = arith.constant 0 : index
      %224 = vector.load %arg21[%c0_104, %c0_105] : memref<2x128xf32, #tpu.memory_space<vmem>>, vector<2x128xf32>
      tpu.vector_store %arg21[%c0_104, %c0_105], %223 {strides = array<i32>} : memref<2x128xf32, #tpu.memory_space<vmem>>, vector<2x128xf32>,
    } else {
    }
    return
  }
  func.func @transform_0(%arg0: i32) -> (i32, i32) {
    %c0_i32 = arith.constant 0 : i32
    %c0_i32_0 = arith.constant 0 : i32
    %c0_i32_1 = arith.constant 0 : i32
    return %c0_i32, %c0_i32_0 : i32, i32
  }
  func.func @transform_1(%arg0: i32) -> (i32, i32) {
    %c0_i32 = arith.constant 0 : i32
    %c0_i32_0 = arith.constant 0 : i32
    %c0_i32_1 = arith.constant 0 : i32
    return %c0_i32, %c0_i32_0 : i32, i32
  }
  func.func @transform_2(%arg0: i32) -> (i32, i32) {
    %c0_i32 = arith.constant 0 : i32
    %c0_i32_0 = arith.constant 0 : i32
    %c0_i32_1 = arith.constant 0 : i32
    return %c0_i32, %c0_i32_0 : i32, i32
  }
  func.func @transform_3(%arg0: i32) -> (i32, i32) {
    %c0_i32 = arith.constant 0 : i32
    %c0_i32_0 = arith.constant 0 : i32
    %c0_i32_1 = arith.constant 0 : i32
    return %c0_i32, %c0_i32_0 : i32, i32
  }
  func.func @transform_4(%arg0: i32) -> (i32, i32, i32) {
    %c0_i32 = arith.constant 0 : i32
    %c0_i32_0 = arith.constant 0 : i32
    %c0_i32_1 = arith.constant 0 : i32
    return %arg0, %c0_i32, %c0_i32_0 : i32, i32, i32
  }
  func.func @transform_5(%arg0: i32) -> (i32, i32, i32) {
    %c0_i32 = arith.constant 0 : i32
    %c0_i32_0 = arith.constant 0 : i32
    %c0_i32_1 = arith.constant 0 : i32
    return %arg0, %c0_i32, %c0_i32_0 : i32, i32, i32
  }
  func.func @transform_6(%arg0: i32) -> (i32, i32, i32, i32) {
    %c0_i32 = arith.constant 0 : i32
    %c0_i32_0 = arith.constant 0 : i32
    %c0_i32_1 = arith.constant 0 : i32
    %c0_i32_2 = arith.constant 0 : i32
    return %arg0, %c0_i32, %c0_i32_0, %c0_i32_1 : i32, i32, i32, i32
  }
  func.func @transform_7(%arg0: i32) -> (i32, i32, i32) {
    %c0_i32 = arith.constant 0 : i32
    %c0_i32_0 = arith.constant 0 : i32
    %c0_i32_1 = arith.constant 0 : i32
    return %arg0, %c0_i32, %c0_i32_0 : i32, i32, i32
  }
  func.func @transform_8(%arg0: i32) -> (i32, i32, i32) {
    %c0_i32 = arith.constant 0 : i32
    %c0_i32_0 = arith.constant 0 : i32
    %c0_i32_1 = arith.constant 0 : i32
    return %arg0, %c0_i32, %c0_i32_0 : i32, i32, i32
  }
  func.func @transform_9(%arg0: i32) -> (i32, i32, i32) {
    %c0_i32 = arith.constant 0 : i32
    %c0_i32_0 = arith.constant 0 : i32
    %c0_i32_1 = arith.constant 0 : i32
    return %arg0, %c0_i32, %c0_i32_0 : i32, i32, i32
  }
  func.func @transform_10(%arg0: i32) -> (i32, i32, i32) {
    %c0_i32 = arith.constant 0 : i32
    %c0_i32_0 = arith.constant 0 : i32
    %c0_i32_1 = arith.constant 0 : i32
    return %arg0, %c0_i32, %c0_i32_0 : i32, i32, i32
  }
  func.func @transform_11(%arg0: i32) -> (i32, i32, i32) {
    %c0_i32 = arith.constant 0 : i32
    %c0_i32_0 = arith.constant 0 : i32
    %c0_i32_1 = arith.constant 0 : i32
    return %arg0, %c0_i32, %c0_i32_0 : i32, i32, i32
  }
  func.func @transform_12(%arg0: i32) -> (i32, i32, i32) {
    %c0_i32 = arith.constant 0 : i32
    %c0_i32_0 = arith.constant 0 : i32
    %c0_i32_1 = arith.constant 0 : i32
    return %arg0, %c0_i32, %c0_i32_0 : i32, i32, i32
  }
  func.func @transform_13(%arg0: i32) -> (i32, i32, i32) {
    %c0_i32 = arith.constant 0 : i32
    %c0_i32_0 = arith.constant 0 : i32
    %c0_i32_1 = arith.constant 0 : i32
    return %arg0, %c0_i32, %c0_i32_0 : i32, i32, i32
  }
  func.func @transform_14(%arg0: i32) -> (i32, i32, i32) {
    %c0_i32 = arith.constant 0 : i32
    %c0_i32_0 = arith.constant 0 : i32
    %c0_i32_1 = arith.constant 0 : i32
    return %arg0, %c0_i32, %c0_i32_0 : i32, i32, i32
  }
  func.func @transform_15(%arg0: i32) -> (i32, i32, i32) {
    %c0_i32 = arith.constant 0 : i32
    %c0_i32_0 = arith.constant 0 : i32
    %c0_i32_1 = arith.constant 0 : i32
    return %arg0, %c0_i32, %c0_i32_0 : i32, i32, i32
  }
  func.func @transform_16(%arg0: i32) -> (i32, i32) {
    %c0_i32 = arith.constant 0 : i32
    %c0_i32_0 = arith.constant 0 : i32
    %c0_i32_1 = arith.constant 0 : i32
    return %c0_i32, %c0_i32_0 : i32, i32
  }
  func.func @transform_17(%arg0: i32) -> (i32, i32) {
    %c0_i32 = arith.constant 0 : i32
    %c0_i32_0 = arith.constant 0 : i32
    %c0_i32_1 = arith.constant 0 : i32
    return %c0_i32, %c0_i32_0 : i32, i32
  }
  func.func @transform_18(%arg0: i32) -> (i32, i32) {
    %c0_i32 = arith.constant 0 : i32
    %c0_i32_0 = arith.constant 0 : i32
    %c0_i32_1 = arith.constant 0 : i32
    return %c0_i32, %c0_i32_0 : i32, i32
  }
  func.func @transform_19(%arg0: i32) -> (i32, i32) {
    %c0_i32 = arith.constant 0 : i32
    %c0_i32_0 = arith.constant 0 : i32
    %c0_i32_1 = arith.constant 0 : i32
    return %c0_i32, %c0_i32_0 : i32, i32
  }
  func.func @transform_20(%arg0: i32) -> (i32, i32) {
    %c0_i32 = arith.constant 0 : i32
    %c0_i32_0 = arith.constant 0 : i32
    %c0_i32_1 = arith.constant 0 : i32
    return %c0_i32, %c0_i32_0 : i32, i32
  }
}

</mosaic_0001>

<bundles_post_ra>
// kernel: sentiment_classifier_forward.1
= control target key start
LH: loop header
LB: loop body
LE: loop exit
PB: predicated region body
PF: predicated region fallthrough
CT: control target
= control target key end

     0   :  { %s5532_s0 = inlined_call_operand.vmem [shape: f32[16,128], index: 0, kind: input, shape index: {}]   ;;  %s5533_s1 = inlined_call_operand.vmem [shape: f32[2,8], index: 1, kind: input, shape index: {}]   ;;  %s5534_s2 = inlined_call_operand.vmem [shape: f32[1,128], index: 2, kind: input, shape index: {}]   ;;  %s5535_s3 = inlined_call_operand.vmem [shape: f32[1,128], index: 3, kind: input, shape index: {}]   ;;  %s5536_s4 = inlined_call_operand.hbm [shape: f32[2,128,384], index: 4, kind: input, shape index: {}]   ;;  %s5537_s5 = inlined_call_operand.vmem [shape: f32[2,1,384], index: 5, kind: input, shape index: {}]   ;;  %s5538_s6 = inlined_call_operand.vmem [shape: f32[2,4,32,128], index: 6, kind: input, shape index: {}]   ;;  %s5539_s7 = inlined_call_operand.vmem [shape: f32[2,1,128], index: 7, kind: input, shape index: {}]   ;;  %s5540_s8 = inlined_call_operand.vmem [shape: f32[2,1,128], index: 8, kind: input, shape index: {}]   ;;  %s5541_s9 = inlined_call_operand.vmem [shape: f32[2,1,128], index: 9, kind: input, shape index: {}]   ;;  %s5542_s10 = inlined_call_operand.hbm [shape: f32[2,128,128], index: 10, kind: input, shape index: {}]   ;;  %s5543_s11 = inlined_call_operand.vmem [shape: f32[2,1,128], index: 11, kind: input, shape index: {}]   ;;  %s5544_s12 = inlined_call_operand.hbm [shape: f32[2,128,128], index: 12, kind: input, shape index: {}]   ;;  %s5545_s13 = inlined_call_operand.vmem [shape: f32[2,1,128], index: 13, kind: input, shape index: {}]   ;;  %s5546_s14 = inlined_call_operand.vmem [shape: f32[2,1,128], index: 14, kind: input, shape index: {}]   ;;  %s5547_s15 = inlined_call_operand.vmem [shape: f32[2,1,128], index: 15, kind: input, shape index: {}]   ;;  %s5548_s16 = inlined_call_operand.hbm [shape: f32[128,128], index: 16, kind: input, shape index: {}]   ;;  %s5549_s17 = inlined_call_operand.vmem [shape: f32[1,128], index: 17, kind: input, shape index: {}]   ;;  %s5550_s18 = inlined_call_operand.hbm [shape: f32[128,128], index: 18, kind: input, shape index: {}]   ;;  %s5551_s19 = inlined_call_operand.vmem [shape: f32[1,128], index: 19, kind: input, shape index: {}]   ;;  %s5552_s20 = inlined_call_operand.hbm [shape: f32[2,128], index: 20, kind: output, shape index: {}]  }
   0x1   :  { %5571 = sst [smem:[#allocation20_spill]] %s5532_s0 }
   0x2   :  { %5572 = sst [smem:[#allocation21_spill]] %s5533_s1 }
   0x3   :  { %5573 = sst [smem:[#allocation22_spill]] %s5534_s2 }
   0x4   :  { %5574 = sst [smem:[#allocation23_spill]] %s5535_s3 }
   0x5   :  { %5575 = sst [smem:[#allocation24_spill]] %s5536_s4 }
   0x6   :  { %5576 = sst [smem:[#allocation25_spill]] %s5537_s5 }
   0x7   :  { %5577 = sst [smem:[#allocation26_spill]] %s5538_s6 }
   0x8   :  { %5578 = sst [smem:[#allocation27_spill]] %s5540_s8 }
   0x9   :  { %5579 = sst [smem:[#allocation28_spill]] %s5541_s9 }
   0xa   :  { %5580 = sst [smem:[#allocation29_spill]] %s5542_s10 }
   0xb   :  { %5581 = sst [smem:[#allocation30_spill]] %s5543_s11 }
   0xc   :  { %5582 = sst [smem:[#allocation31_spill]] %s5544_s12 }
   0xd   :  { %5583 = sst [smem:[#allocation32_spill]] %s5545_s13 }
   0xe   :  { %5584 = sst [smem:[#allocation33_spill]] %s5546_s14 }
   0xf   :  { %5585 = sst [smem:[#allocation34_spill]] %s5547_s15 }
  0x10   :  { %5586 = sst [smem:[#allocation35_spill]] %s5548_s16 }
  0x11   :  { %5587 = sst [smem:[#allocation36_spill]] %s5549_s17 }
  0x12   :  { %5588 = sst [smem:[#allocation37_spill]] %s5550_s18 }
  0x13   :  { %5589 = sst [smem:[#allocation38_spill]] %s5551_s19 }
  0x14   :  { %5590 = sst [smem:[#allocation39_spill]] %s5552_s20 }
  0x15   :  { %25 = vsyncpa [#allocation4], 0 }
  0x16   :  { %27 = vsyncpa [#allocation4 + $0x1], 0 }
  0x17   :  { %28 = vsyncpa [#allocation7], 0 }
  0x18   :  { %30 = vsyncpa [#allocation7 + $0x1], 0 }
  0x19   :  { %31 = vsyncpa [#allocation10], 0 }
  0x1a   :  { %32 = vsyncpa [#allocation5], 0  ;;  %s4809_s1 = smov 0   ;;  %s4811_s22 = smov 0  }
  0x1b   :  { %s4813_s23 = smov 0   ;;  %s4815_s24 = smov 0  }
  0x1c LB: > { %5591 = sst [smem:[#allocation17_spill]] %s4679_s23  ;;  %s4828_s2 = sadd.s32 4294967295, %s4683_s24   ;;  %s4683_s24 = sphi %s4815_s24, %s5639_s24   ;;  %s4679_s23 = sphi %s4813_s23, %s5641_s23   ;;  %s4675_s22 = sphi %s4811_s22, %s5643_s22   ;;  %s4671_s1 = sphi %s4809_s1, %s5642_s1  }
  0x1d   : > { %s4831_s25 = sadd.s32 1, %s4683_s24   ;;  %s129_s26 = sadd.s32 1, %s4679_s23 }
  0x1e   : > { %5592 = sst [smem:[#allocation18_spill]] %s4831_s25  ;;  %s126_s3 = ssub.s32 %s4683_s24, %s4831_s25 }
  0x1f   : > { %p127_p0 = scmp.eq.s32.totalorder %s126_s3, 0  ;;  %p136_p1 = scmp.ne.s32.totalorder %s4679_s23, %s4675_s22 }
  0x20   : > { %p137_p2 = scmp.eq.s32.totalorder %s4683_s24, 0  ;;  %p142_p3 = scmp.ne.s32.totalorder %s4675_s22, %s4671_s1 }
  0x21   : > { %s4841_s27 = scalar_select %p127_p0, %s4679_s23, %s129_s26  }
  0x22   : > { %p4843_p4 = por %p137_p2, %p136_p1  ;;  %p5559_p5 = scmp.eq.s32.totalorder %s4828_s2, 0 }
  0x23   : > { %5593 = sst [smem:[#allocation19_spill]] %s4841_s27  ;;  %p3580_p6 = scmp.ge.s32.totalorder %s4683_s24, 1 }
  0x24   : > { %p544_p7 = scmp.lt.s32.totalorder %s4683_s24, 3  ;;  %p4852_p8 = por %p5559_p5, %p142_p3 }
  0x25   : > { %s4685_s30 = smov [#allocation9]   ;;  %p4362_p13 = scmp.lt.s32.totalorder %s4683_s24, 2 }
  0x26   : > { %s5595_s4 = scalar_select %p4852_p8, 1, 0 }
  0x27   : > { %p4857_p10 = pnand %p3580_p6, %p544_p7  ;;  %s568_s0 = sshll.u32 %s4685_s30, 4  ;;  %s569_s0 = int_to_ptr.vmem [resolvable:$true] %s568_s0 }
  0x28   : > { %s4871_s1 = sand.u32 1, %s4679_s23   ;;  %s655_s3 = sand.u32 1, %s4683_s24  }
  0x29   : > { %s5596_s29 = scalar_select %p4857_p10, 1, 0 }
  0x2a   : > { %p4343_p11 = pneg %p4857_p10  ;;  %p4876_p0 = pnand %p4362_p13, %p4843_p4 }
  0x2b   : > { %s5599_s16 = sld [smem:[#allocation35_spill]] }
  0x2c   : > { %p4865_p12 = pnand %p4343_p11, %p5559_p5 }
  0x2d   : > { %s5598_s26 = scalar_select %p4876_p0, 1, 0 }
  0x2e   : > { %s5597_s21 = scalar_select %p4865_p12, 1, 0 }
  0x2f   : > { %p5564_p2 = pneg %p4865_p12 }
  0x31   : > { %s4465_s25 = scalar_lea.hbm %s5599_s16, 2048 }
  0x32   : > { %p4466_p1 = scmp.ne.s32.totalorder %s5599_s16, %s4465_s25  ;;  %p4472_p4 = scmp.lt.u32.totalorder %s4465_s25, %s5599_s16 }
  0x34   : > { %p4468_p3 = pnand %p5564_p2, %p4466_p1 }
  0x36   : > { %p4469_p6 = pneg %p4468_p3 }
  0x38   : > { %p4474_p7 = pnand %p4472_p4, %p4469_p6 }
  0x3a   : > { %4477 = shalt.err (!%p4474_p7)
}
  0x3b   : > { %s4478_s17 = scalar_lea.vmem %s569_s0, 2048  ;;  %p4486_p5 = scmp.lt.s32.totalorder %s569_s0, %s569_s0 }
  0x3c   : > { %p4479_p11 = scmp.ne.s32.totalorder %s569_s0, %s4478_s17  ;;  %p4487_p8 = scmp.lt.s32.totalorder %s4478_s17, %s4478_s17 }
  0x3e   : > { %p4481_p13 = pnand %p4479_p11, %p5564_p2  ;;  %p4488_p10 = por %p4487_p8, %p4486_p5 }
  0x40   : > { %p4482_p9 = pneg %p4481_p13 }
  0x42   : > { %p4489_p0 = pnand %p4488_p10, %p4482_p9 }
  0x44   : > { %4492 = shalt.err (!%p4489_p0)
}
  0x45   : > { %s4686_s19 = smov 128   ;;  %s4687_s20 = smov 8  }
  0x46   : > { %4346 = dma.hbm_to_vmem [thread:$0]  (!%p4865_p12), %s5599_s16, 2048, %s569_s0, [#allocation10], %s4686_s19, %s4686_s19, %s4687_s20  }
  0x47   : > { %s3585_s17 = sshll.u32 %s4871_s1, 7  ;;  %s5563_s27 = sshll.u32 %s4683_s24, 11 }
  0x48   : > { %s5600_s10 = sld [smem:[#allocation29_spill]]  ;;  %s659_s14 = scalar_lea.vmem [#allocation6], %s3585_s17 }
  0x49   : > { %s666_s13 = sshll.u32 %s659_s14, 4  ;;  %s4918_s11 = scalar_lea.sflag [#allocation7], %s655_s3  ;;  %s4916_s13 = int_to_ptr.vmem [resolvable:$true] %s666_s13 }
  0x4a   : > { %p5601_p8 = scmp.ne.s32.totalorder %s5598_s26, 0 }
  0x4c   : > { %p4924_p9 = pneg %p5601_p8 }
  0x4e   : > { %s4912_s15 = scalar_lea.hbm %s5600_s10, %s5563_s27  ;;  %s4498_s28 = scalar_lea.hbm %s5600_s10, 4096 }
  0x4f   : > { %s4493_s0 = scalar_lea.hbm %s4912_s15, 2048  ;;  %p4499_p1 = scmp.lt.u32.totalorder %s4912_s15, %s5600_s10 }
  0x50   : > { %p4494_p5 = scmp.ne.s32.totalorder %s4912_s15, %s4493_s0  ;;  %p4500_p3 = scmp.lt.u32.totalorder %s4498_s28, %s4493_s0 }
  0x51   : > { %s5602_s23 = scalar_select %p4924_p9, 1, 0 }
  0x52   : > { %p4496_p10 = pnand %p4924_p9, %p4494_p5  ;;  %p4501_p6 = por %p4500_p3, %p4499_p1 }
  0x53   : > { %p4502_p4 = scmp.lt.u32.totalorder %s4493_s0, %s4912_s15 }
  0x54   : > { %p4497_p0 = pneg %p4496_p10 }
  0x55   : > { %p4503_p7 = por %p4502_p4, %p4501_p6 }
  0x57   : > { %p4504_p11 = pnand %p4503_p7, %p4497_p0 }
  0x59   : > { %4507 = shalt.err (!%p4504_p11)
}
  0x5a   : > { %s4508_s3 = scalar_lea.vmem %s4916_s13, 2048  ;;  %s4688_s25 = smov [#allocation6]  }
  0x5b   : > { %p4509_p13 = scmp.ne.s32.totalorder %s4916_s13, %s4508_s3  ;;  %s4513_s30 = sshll.u32 %s4688_s25, 4  ;;  %s4514_s30 = int_to_ptr.vmem [resolvable:$false] %s4513_s30 }
  0x5c   : > { %s4515_s27 = scalar_lea.vmem %s4514_s30, 4096  ;;  %p4516_p2 = scmp.lt.s32.totalorder %s4916_s13, %s4514_s30 }
  0x5d   : > { %p4511_p5 = pnand %p4509_p13, %p4924_p9  ;;  %p4517_p12 = scmp.lt.s32.totalorder %s4515_s27, %s4508_s3 }
  0x5f   : > { %p4512_p10 = pneg %p4511_p5  ;;  %p4518_p1 = por %p4517_p12, %p4516_p2 }
  0x61   : > { %p4519_p3 = pnand %p4518_p1, %p4512_p10 }
  0x63   : > { %4522 = shalt.err (!%p4519_p3)
}
  0x64   : > { %4356 = dma.hbm_to_vmem [thread:$0]  (!%p5601_p8), %s4912_s15, 2048, %s4916_s13, %s4918_s11, %s4686_s19, %s4686_s19, %s4687_s20  }
  0x65   : > { %s686_s0 = scalar_lea.vmem [#allocation8], %s3585_s17  ;;  %s5603_s14 = sshll.u32 %s4683_s24, 11 }
  0x66   : > { %s693_s28 = sshll.u32 %s686_s0, 4  ;;  %s5604_s12 = sld [smem:[#allocation31_spill]]  ;;  %s4960_s28 = int_to_ptr.vmem [resolvable:$true] %s693_s28 }
  0x67   : > { %s4689_s27 = smov [#allocation11]   ;;  %s5605_s18 = sld [smem:[#allocation37_spill]] }
  0x68   : > { %s584_s10 = sshll.u32 %s4689_s27, 4  ;;  %p5606_p2 = scmp.ne.s32.totalorder %s5597_s21, 0  ;;  %s585_s10 = int_to_ptr.vmem [resolvable:$true] %s584_s10 }
  0x6a   : > { %p5607_p0 = pneg %p5606_p2 }
  0x6c   : > { %s4958_s30 = scalar_lea.hbm %s5604_s12, %s5603_s14 }
  0x6d   : > { %s4523_s8 = scalar_lea.hbm %s5605_s18, 2048 }
  0x6e   : > { %p4524_p12 = scmp.ne.s32.totalorder %s5605_s18, %s4523_s8  ;;  %p4530_p7 = scmp.lt.u32.totalorder %s4523_s8, %s5605_s18 }
  0x70   : > { %p4526_p6 = pnand %p4524_p12, %p5607_p0 }
  0x72   : > { %p4527_p4 = pneg %p4526_p6 }
  0x74   : > { %p4532_p11 = pnand %p4530_p7, %p4527_p4 }
  0x76   : > { %4535 = shalt.err (!%p4532_p11)
}
  0x77   : > { %s4536_s0 = scalar_lea.vmem %s585_s10, 2048  ;;  %p5608_p5 = pmov %p5607_p0 }
  0x78   : > { %p4537_p13 = scmp.ne.s32.totalorder %s585_s10, %s4536_s0  ;;  %p4544_p3 = scmp.lt.s32.totalorder %s585_s10, %s585_s10 }
  0x79   : > { %p4545_p8 = scmp.lt.s32.totalorder %s4536_s0, %s4536_s0 }
  0x7a   : > { %p4539_p10 = pnand %p4537_p13, %p5608_p5 }
  0x7b   : > { %p4546_p9 = por %p4545_p8, %p4544_p3 }
  0x7c   : > { %p4540_p1 = pneg %p4539_p10 }
  0x7e   : > { %p4547_p0 = pnand %p4546_p9, %p4540_p1 }
  0x80   : > { %4550 = shalt.err (!%p4547_p0)
}
  0x81   : > { %4349 = dma.hbm_to_vmem [thread:$0]  (!%p5606_p2), %s5605_s18, 2048, %s585_s10, [#allocation10], %s4686_s19, %s4686_s19, %s4687_s20  }
  0x82   : > { %s4321_s9 = smul.u32 384, %s4871_s1  ;;  %s5609_s25 = sld [smem:[#allocation24_spill]] }
  0x83   : > { %s4322_s16 = smul.u32 6144, %s4683_s24  ;;  %s602_s15 = scalar_lea.sflag [#allocation4], %s4871_s1 }
  0x84   : > { %s605_s21 = scalar_lea.vmem [#allocation3], %s4321_s9  ;;  %p5610_p9 = scmp.ne.s32.totalorder %s5602_s23, 0 }
  0x85   : > { %s612_s13 = sshll.u32 %s605_s21, 4  ;;  %s4992_s13 = int_to_ptr.vmem [resolvable:$true] %s612_s13 }
  0x88   : > { %s4990_s27 = scalar_lea.hbm %s5609_s25, %s4322_s16  ;;  %s4556_s0 = scalar_lea.hbm %s5609_s25, 12288 }
  0x89   : > { %s4551_s17 = scalar_lea.hbm %s4990_s27, 6144  ;;  %p4557_p6 = scmp.lt.u32.totalorder %s4990_s27, %s5609_s25 }
  0x8a   : > { %p4552_p8 = scmp.ne.s32.totalorder %s4990_s27, %s4551_s17  ;;  %p4558_p4 = scmp.lt.u32.totalorder %s4556_s0, %s4551_s17 }
  0x8b   : > { %p4560_p11 = scmp.lt.u32.totalorder %s4551_s17, %s4990_s27 }
  0x8c   : > { %p4554_p12 = pnand %p4552_p8, %p5610_p9  ;;  %p4559_p7 = por %p4558_p4, %p4557_p6 }
  0x8e   : > { %p4555_p2 = pneg %p4554_p12  ;;  %p4561_p13 = por %p4560_p11, %p4559_p7 }
  0x90   : > { %p4562_p5 = pnand %p4561_p13, %p4555_p2 }
  0x92   : > { %4565 = shalt.err (!%p4562_p5)
}
  0x93   : > { %s4566_s9 = scalar_lea.vmem %s4992_s13, 6144  ;;  %s4690_s16 = smov [#allocation3]  }
  0x94   : > { %p4567_p10 = scmp.ne.s32.totalorder %s4992_s13, %s4566_s9  ;;  %s4571_s14 = sshll.u32 %s4690_s16, 4  ;;  %s4572_s14 = int_to_ptr.vmem [resolvable:$false] %s4571_s14 }
  0x95   : > { %s4573_s3 = scalar_lea.vmem %s4572_s14, 12288  ;;  %p4574_p0 = scmp.lt.s32.totalorder %s4992_s13, %s4572_s14 }
  0x96   : > { %p4569_p1 = pnand %p4567_p10, %p5610_p9  ;;  %p4575_p8 = scmp.lt.s32.totalorder %s4573_s3, %s4566_s9 }
  0x98   : > { %p4570_p3 = pneg %p4569_p1  ;;  %p4576_p12 = por %p4575_p8, %p4574_p0 }
  0x9a   : > { %p4577_p6 = pnand %p4576_p12, %p4570_p3 }
  0x9c   : > { %4580 = shalt.err (!%p4577_p6)
}
  0x9d   : > { %s4691_s21 = smov 384   ;;  %s4692_s17 = smov 24  }
  0x9e   : > { %p5611_p2 = scmp.ne.s32.totalorder %s5598_s26, 0  ;;  %s4581_s10 = scalar_lea.hbm %s4958_s30, 2048 }
  0x9f   : > { %p4582_p4 = scmp.ne.s32.totalorder %s4958_s30, %s4581_s10  ;;  %s4586_s5 = scalar_lea.hbm %s5604_s12, 4096 }
  0xa0   : > { %4353 = dma.hbm_to_vmem [thread:$0]  (!%p5611_p2), %s4990_s27, 6144, %s4992_s13, %s602_s15, %s4691_s21, %s4691_s21, %s4692_s17  }
  0xa1   : > { %p4584_p7 = pnand %p4582_p4, %p5610_p9  ;;  %p4587_p13 = scmp.lt.u32.totalorder %s4958_s30, %s5604_s12 }
  0xa2   : > { %p4588_p5 = scmp.lt.u32.totalorder %s4586_s5, %s4581_s10  ;;  %p4590_p1 = scmp.lt.u32.totalorder %s4581_s10, %s4958_s30 }
  0xa3   : > { %p4585_p11 = pneg %p4584_p7 }
  0xa4   : > { %p4589_p10 = por %p4588_p5, %p4587_p13 }
  0xa6   : > { %p4591_p3 = por %p4590_p1, %p4589_p10 }
  0xa8   : > { %p4592_p0 = pnand %p4591_p3, %p4585_p11 }
  0xaa   : > { %4595 = shalt.err (!%p4592_p0)
}
  0xab   : > { %s4596_s1 = scalar_lea.vmem %s4960_s28, 2048  ;;  %s4693_s27 = smov [#allocation8]  }
  0xac   : > { %p4597_p8 = scmp.ne.s32.totalorder %s4960_s28, %s4596_s1  ;;  %s4601_s13 = sshll.u32 %s4693_s27, 4  ;;  %s4602_s13 = int_to_ptr.vmem [resolvable:$false] %s4601_s13 }
  0xad   : > { %s4603_s15 = scalar_lea.vmem %s4602_s13, 4096  ;;  %p4604_p4 = scmp.lt.s32.totalorder %s4960_s28, %s4602_s13 }
  0xae   : > { %p4599_p12 = pnand %p4597_p8, %p5610_p9  ;;  %p4605_p7 = scmp.lt.s32.totalorder %s4603_s15, %s4596_s1 }
  0xb0   : > { %p4600_p6 = pneg %p4599_p12  ;;  %p4606_p13 = por %p4605_p7, %p4604_p4 }
  0xb2   : > { %p4607_p5 = pnand %p4606_p13, %p4600_p6 }
  0xb4   : > { %4610 = shalt.err (!%p4607_p5)
}
  0xb5   : > { %4359 = dma.hbm_to_vmem [thread:$0]  (!%p5611_p2), %s4958_s30, 2048, %s4960_s28, %s4918_s11, %s4686_s19, %s4686_s19, %s4687_s20  }
  0xb6   : > { %p5612_p9 = scmp.ne.s32.totalorder %s5596_s29, 0 }
  0xb7   : > { %s725_s23 = sand.u32 (!%p5612_p9), 1, %s4675_s22   ;;  %p5613_p11 = scmp.ne.s32.totalorder (!%p5612_p9), %s5595_s4, 0 }
  0xb8   : > { %723 = sbr.rel (%p5612_p9) target bundleno = 4976 (0x1370), region = 100  ;;  %s726_s14 = scalar_lea.sflag (!%p5612_p9), [#allocation4], %s725_s23 }
  0xb9   : > { %s4323_s16 = smul.u32 (!%p5612_p9), 384, %s725_s23 }
  0xbb   : > { %s5046_s3 = scalar_lea.vmem (!%p5612_p9), [#allocation3], %s4323_s16 }
  0xbf   : > { %4654 = dma.done.wait (%p5613_p11), %s726_s14, 6144  }
  0xc0   : > { %4656 = vsyncadd (%p5613_p11), %s726_s14, 4294961152  ;;  %s734_s26 = sand.u32 1, %s4828_s2   ;;  %s3592_s21 = sshll.u32 %s725_s23, 7 }
  0xc1   : > { %s735_s11 = scalar_lea.sflag [#allocation7], %s734_s26  ;;  %s5053_s19 = scalar_lea.vmem [#allocation6], %s3592_s21 }
  0xc2   : > { %4658 = dma.done.wait (%p5613_p11), %s735_s11, 4096  }
  0xc3   : > { %4660 = vsyncadd (%p5613_p11), %s735_s11, 4294963200  ;;  %s5059_s29 = scalar_lea.vmem [#allocation8], %s3592_s21  ;;  %p5614_p2 = scmp.eq.s32.totalorder %s4828_s2, 0 }
  0xc5   : > { %4662 = dma.done.wait (%p5614_p2), [#allocation10], 4096   ;;  %p5615_p10 = pmov %p5614_p2 }
  0xc6   : > { %p847_p1 = scmp.lt.s32.totalorder %s4828_s2, 1  ;;  %v877_v0 = vlaneseq  ;;  %s5616_s6 = sld [smem:[#allocation26_spill]]  ;;  %v4694_v2 = vmov 0.0  }
  0xc7   : > { %4664 = vsyncadd (%p5615_p10), [#allocation10], 4294963200  ;;  %s5617_s1 = sld [smem:[#allocation25_spill]]  ;;  %s5618_s23 = sld [smem:[#allocation27_spill]] }
  0xc8   : > { %s5067_s20 = scalar_select %p847_p1, %s4828_s2, 1  ;;  %v878_v1 = vand.u32 127, %v877_v0 }
  0xc9   : > { %s5619_s21 = sld [smem:[#allocation28_spill]]  ;;  %s5620_s17 = sld [smem:[#allocation30_spill]] }
  0xca   : > { %s4324_s4 = smul.u32 3, %s5067_s20  ;;  %s3663_s28 = sshll.u32 %s5067_s20, 7  ;;  %vm879_vm0 = vcmp.lt.s32.totalorder %v878_v1, 32 }
  0xcb   : > { %v5082_v3 = vsel %vm879_vm0, 1.0, %v4694_v2  ;;  %s5623_s13 = sld [smem:[#allocation34_spill]]  ;;  %p5624_p3 = scmp.ne.s32.totalorder %s4828_s2, 0 }
  0xcc   : > { %s5075_s10 = scalar_lea.vmem %s5616_s6, %s3663_s28  ;;  %s5621_s6 = sld [smem:[#allocation32_spill]] }
  0xcd   : > { %s5087_s27 = scalar_lea.vmem %s5617_s1, %s4324_s4  ;;  %s861_s16 = scalar_lea.vmem %s5618_s23, %s5067_s20 }
  0xce   : > { %s5622_s4 = sld [smem:[#allocation33_spill]]  ;;  %885 = sbr.rel (%p5624_p3) target bundleno = 533 (0x215), region = 124 }
  0xcf   : > { %s864_s11 = scalar_lea.vmem %s5619_s21, %s5067_s20  ;;  %s867_s24 = scalar_lea.vmem %s5620_s17, %s5067_s20 }
  0xd0   : > { %s5625_s26 = sld [smem:[#allocation20_spill]] (!%p5624_p3)  ;;  %s5626_s25 = sld [smem:[#allocation22_spill]] (!%p5624_p3) }
  0xd1   : > { %s876_s15 = scalar_lea.vmem %s5623_s13, %s5067_s20  ;;  %s5627_s17 = sld [smem:[#allocation23_spill]] (!%p5624_p3) }
  0xd2   : > { %s870_s12 = scalar_lea.vmem %s5621_s6, %s5067_s20 }
  0xd4   : > { %s873_s9 = scalar_lea.vmem %s5622_s4, %s5067_s20 }
  0xd6   : > { %v886_v4 = vld [vmem:[%s5625_s26] sm:$0xff]  ;;  %v887_v5 = vld [vmem:[%s5625_s26 + $0x8] sm:$0xff] }
  0xd7   : > { %890 = vadd.xlane.f32.xlu0 %v886_v4  ;;  %v3600_v23 = vld [vmem:[%s5626_s25] ss:$0 sm:$0xff] }
  0xd8   : > { %v3601_v25 = vld [vmem:[%s5627_s17] ss:$0 sm:$0xff] }
  0xdb   : > { %892 = vadd.xlane.f32.xlu0 %v887_v5 }
 0x164   : > { %v891_v6 = vpop.xlane.xlu0 %890 }
 0x165   : > { %v894_v7 = vmul.f32 0.03125, %v891_v6 }
 0x167   : > { %v896_v8 = vsub.f32 %v886_v4, %v894_v7 }
 0x168   : > { %v893_v9 = vpop.xlane.xlu0 %892 }
 0x169   : > { %v895_v10 = vmul.f32 0.03125, %v893_v9  ;;  %v898_v11 = vmul.f32 %v5082_v3, %v896_v8 }
 0x16b   : > { %v897_v12 = vsub.f32 %v887_v5, %v895_v10  ;;  %v900_v13 = vmul.f32 %v898_v11, %v898_v11 }
 0x16d   : > { %v899_v14 = vmul.f32 %v5082_v3, %v897_v12  ;;  %902 = vadd.xlane.f32.xlu1 %v900_v13 }
 0x16f   : > { %v901_v15 = vmul.f32 %v899_v14, %v899_v14 }
 0x171   : > { %904 = vadd.xlane.f32.xlu1 %v901_v15 }
 0x1fa   : > { %v903_v16 = vpop.xlane.xlu1 %902 }
 0x1fb   : > { %v906_v17 = vmul.f32 0.03125, %v903_v16 }
 0x1fd   : > { %v908_v18 = vadd.f32 1e-12, %v906_v17 }
 0x1fe   : > { %v905_v19 = vpop.xlane.xlu1 %904 }
 0x1ff   : > { %4415 = vrsqrt.f32 %v908_v18  ;;  %v907_v20 = vmul.f32 0.03125, %v905_v19 }
 0x201   : > { %v909_v21 = vadd.f32 1e-12, %v907_v20 }
 0x203   : > { %4417 = vrsqrt.f32 %v909_v21 }
 0x209   : > { %v4416_v22 = vpop.eup %4415 }
 0x20a   : > { %v912_v24 = vmul.f32 %v4416_v22, %v898_v11 }
 0x20c   : > { %v920_v26 = vmul.f32 %v3600_v23, %v912_v24 }
 0x20d   : > { %v4418_v27 = vpop.eup %4417 }
 0x20e   : > { %v928_v28 = vadd.f32 %v3601_v25, %v920_v26  ;;  %v913_v29 = vmul.f32 %v4418_v27, %v899_v14 }
 0x210   : > { %930 = vst [vmem:[#allocation2] sm:$0xff] %v928_v28  ;;  %v921_v30 = vmul.f32 %v3600_v23, %v913_v29 }
 0x212   : > { %v929_v31 = vadd.f32 %v3601_v25, %v921_v30 }
 0x214   : > { %931 = vst [vmem:[#allocation2 + $0x8] sm:$0xff] %v929_v31 }
 0x215 PF: > { %v935_v32 = vld [vmem:[%s5046_s3 + $0x8] sm:$0xff]  ;;  %v938_v33 = vld [vmem:[%s5046_s3 + $0x20] sm:$0xff]  ;;  %1063 = vmatprep.mubr.f32.mxu0 %v4694_v2  ;;  %v937_v36 = vld [vmem:[%s5046_s3 + $0x18] sm:$0xff]  ;;  %vm4695_vm1 = vmmov 0   ;;  %vm1175_vm2 = vcmask 261120   ;;  %s5628_s8 = sld [smem:[#allocation21_spill]]  ;;  %s5629_s14 = scalar_lea.vmem %s5539_s7, %s5067_s20 }
 0x216   : > { %v934_v34 = vld [vmem:[%s5046_s3] sm:$0xff]  ;;  %v4107_v35 = vpack.c.bf16 %v938_v33, %v935_v32  ;;  %v941_v37 = vld [vmem:[%s5046_s3 + $0x38] sm:$0xff]  ;;  %v944_v38 = vld [vmem:[%s5046_s3 + $0x50] sm:$0xff]  ;;  %vm1342_vm3 = vcmask 64512   ;;  %s4698_s4 = smov 64   ;;  %s4699_s1 = smov 32  }
 0x217   : > { %v4109_v39 = vpack.c.bf16 %v937_v36, %v934_v34  ;;  %v4111_v40 = vpack.c.bf16 %v944_v38, %v941_v37  ;;  %v940_v41 = vld [vmem:[%s5046_s3 + $0x30] sm:$0xff]  ;;  %v943_v42 = vld [vmem:[%s5046_s3 + $0x48] sm:$0xff]  ;;  %v950_v44 = vld [vmem:[%s5046_s3 + $0x80] sm:$0xff]  ;;  %p3654_p0 = scmp.ne.s32.totalorder %s4828_s2, 1 }
 0x218   : > { %v947_v43 = vld [vmem:[%s5046_s3 + $0x68] sm:$0xff]  ;;  %4108 = vmatprep.subr.bf16.mxu0 %v4107_v35  ;;  %v4113_v45 = vpack.c.bf16 %v943_v42, %v940_v41  ;;  %v946_v47 = vld [vmem:[%s5046_s3 + $0x60] sm:$0xff]  ;;  %v949_v48 = vld [vmem:[%s5046_s3 + $0x78] sm:$0xff]  ;;  %vm4701_vm4 = vmmov (!%p3654_p0), 0   ;;  %vm3205_vm5 = vcmask (!%p3654_p0), 1041409  }
 0x219   : > { %4110 = vmatpush1.bf16.msra.mxu0 %v4109_v39  ;;  %v4115_v46 = vpack.c.bf16 %v950_v44, %v947_v43  ;;  %v953_v49 = vld [vmem:[%s5046_s3 + $0x98] sm:$0xff]  ;;  %v956_v50 = vld [vmem:[%s5046_s3 + $0xb0] sm:$0xff]  ;;  %v4117_v51 = vpack.c.bf16 %v949_v48, %v946_v47  ;;  %v955_v54 = vld [vmem:[%s5046_s3 + $0xa8] sm:$0xff] }
 0x21a   : > { %4112 = vmatprep.subr.bf16.mxu0 %v4111_v40  ;;  %v4119_v52 = vpack.c.bf16 %v956_v50, %v953_v49  ;;  %v952_v53 = vld [vmem:[%s5046_s3 + $0x90] sm:$0xff]  ;;  %v959_v55 = vld [vmem:[%s5046_s3 + $0xc8] sm:$0xff]  ;;  %v962_v56 = vld [vmem:[%s5046_s3 + $0xe0] sm:$0xff] }
 0x21b   : > { %v5148_v57 = vld [vmem:[#allocation2] sm:$0xff]  ;;  %v939_v59 = vld [vmem:[%s5046_s3 + $0x28] sm:$0xff]  ;;  %v4121_v60 = vpack.c.bf16 %v955_v54, %v952_v53  ;;  %v958_v61 = vld [vmem:[%s5046_s3 + $0xc0] sm:$0xff]  ;;  %v4123_v4 = vpack.c.bf16 %v962_v56, %v959_v55 }
 0x21c   : > { %v936_v58 = vld [vmem:[%s5046_s3 + $0x10] sm:$0xff]  ;;  %3840 = vmatprep.mubr.f32.mxu1 %v5148_v57  ;;  %v942_v63 = vld [vmem:[%s5046_s3 + $0x40] sm:$0xff]  ;;  %v945_v1 = vld [vmem:[%s5046_s3 + $0x58] sm:$0xff] }
 0x21d   : > { %4114 = vmatpush1.bf16.msra.mxu0 %v4113_v45  ;;  %v4139_v62 = vpack.c.bf16 %v939_v59, %v936_v58  ;;  %v961_v5 = vld [vmem:[%s5046_s3 + $0xd8] sm:$0xff]  ;;  %v4143_v6 = vpack.c.bf16 %v945_v1, %v942_v63  ;;  %v948_v7 = vld [vmem:[%s5046_s3 + $0x70] sm:$0xff]  ;;  %v951_v8 = vld [vmem:[%s5046_s3 + $0x88] sm:$0xff]  ;;  %v985_v45 = vshrl.u32 %v877_v0, 7 }
 0x21e   : > { %4116 = vmatprep.subr.bf16.mxu0 %v4115_v46  ;;  %v965_v9 = vld [vmem:[%s5046_s3 + $0xf8] sm:$0xff]  ;;  %v968_v10 = vld [vmem:[%s5046_s3 + $0x110] sm:$0xff]  ;;  %v4125_v11 = vpack.c.bf16 %v961_v5, %v958_v61  ;;  %v4147_v13 = vpack.c.bf16 %v951_v8, %v948_v7  ;;  %v967_v15 = vld [vmem:[%s5046_s3 + $0x108] sm:$0xff] }
 0x21f   : > { %4140 = vmatprep.subr.bf16.mxu1 %v4139_v62  ;;  %v964_v12 = vld [vmem:[%s5046_s3 + $0xf0] sm:$0xff]  ;;  %v4127_v14 = vpack.c.bf16 %v968_v10, %v965_v9  ;;  %v954_v16 = vld [vmem:[%s5046_s3 + $0xa0] sm:$0xff]  ;;  %v957_v17 = vld [vmem:[%s5046_s3 + $0xb8] sm:$0xff]  ;;  %v990_v46 = vsub.s32 1, %v985_v45  ;;  %v5195_v48 = vsub.s32 0, %v985_v45  ;;  %v994_v55 = vsub.s32 2, %v985_v45 }
 0x220   : > { %4142 = vmatpush3.bf16.msra.mxu1 %v4139_v62  ;;  %v971_v18 = vld [vmem:[%s5046_s3 + $0x128] sm:$0xff]  ;;  %v974_v19 = vld [vmem:[%s5046_s3 + $0x140] sm:$0xff]  ;;  %v4129_v20 = vpack.c.bf16 %v967_v15, %v964_v12  ;;  %v4151_v22 = vpack.c.bf16 %v957_v17, %v954_v16  ;;  %v973_v24 = vld [vmem:[%s5046_s3 + $0x138] sm:$0xff] }
 0x221   : > { %4118 = vmatpush1.bf16.msra.mxu0 %v4117_v51  ;;  %4144 = vmatprep.subr.bf16.mxu1 %v4143_v6  ;;  %v970_v21 = vld [vmem:[%s5046_s3 + $0x120] sm:$0xff]  ;;  %v4131_v23 = vpack.c.bf16 %v974_v19, %v971_v18  ;;  %v960_v25 = vld [vmem:[%s5046_s3 + $0xd0] sm:$0xff]  ;;  %v963_v26 = vld [vmem:[%s5046_s3 + $0xe8] sm:$0xff] }
 0x222   : > { %4120 = vmatprep.subr.bf16.mxu0 %v4119_v52  ;;  %v977_v27 = vld [vmem:[%s5046_s3 + $0x158] sm:$0xff]  ;;  %v980_v28 = vld [vmem:[%s5046_s3 + $0x170] sm:$0xff]  ;;  %v4133_v29 = vpack.c.bf16 %v973_v24, %v970_v21  ;;  %v4155_v31 = vpack.c.bf16 %v963_v26, %v960_v25  ;;  %v979_v33 = vld [vmem:[%s5046_s3 + $0x168] sm:$0xff] }
 0x223   : > { %v976_v30 = vld [vmem:[%s5046_s3 + $0x150] sm:$0xff]  ;;  %v4135_v32 = vpack.c.bf16 %v980_v28, %v977_v27  ;;  %v966_v34 = vld [vmem:[%s5046_s3 + $0x100] sm:$0xff]  ;;  %v969_v35 = vld [vmem:[%s5046_s3 + $0x118] sm:$0xff] }
 0x224   : > { %4146 = vmatpush3.bf16.msra.mxu1 %v4143_v6  ;;  %v4137_v36 = vpack.c.bf16 %v979_v33, %v976_v30  ;;  %v4159_v37 = vpack.c.bf16 %v969_v35, %v966_v34  ;;  %v972_v38 = vld [vmem:[%s5046_s3 + $0x130] sm:$0xff]  ;;  %v975_v39 = vld [vmem:[%s5046_s3 + $0x148] sm:$0xff]  ;;  %v978_v41 = vld [vmem:[%s5046_s3 + $0x160] sm:$0xff] }
 0x225   : > { %4122 = vmatpush1.bf16.msra.mxu0 %v4121_v60  ;;  %4148 = vmatprep.subr.bf16.mxu1 %v4147_v13  ;;  %v4163_v40 = vpack.c.bf16 %v975_v39, %v972_v38  ;;  %v981_v42 = vld [vmem:[%s5046_s3 + $0x178] sm:$0xff]  ;;  %v982_v47 = vld [vmem:[%s5087_s27] sm:$0x7]  ;;  %s4696_s3 = smov 96  }
 0x226   : > { %4124 = vmatprep.subr.bf16.mxu0 %v4123_v4  ;;  %v5184_v43 = vld [vmem:[#allocation2 + $0x8] sm:$0xff]  ;;  %v4167_v44 = vpack.c.bf16 %v981_v42, %v978_v41  ;;  %v991_v49 = vrot.slane %v982_v47, %v990_v46  ;;  %v987_v51 = vrot.slane %v982_v47, %v5195_v48  ;;  %v995_v59 = vrot.slane %v982_v47, %v994_v55  ;;  %v3602_v8 = vld.sshfl [vmem:[%s5628_s8] sm:$0x11 pattern:$0x75316420] }
 0x227   : > { %v4697_v4 = vmov 1966171168   ;;  %v1160_v10 = vcombine.high %v3602_v8, %v3602_v8 }
 0x228   : > { %4150 = vmatpush3.bf16.msra.mxu1 %v4147_v13  ;;  %v1162_v5 = vunpack.c.l.s4 %v4697_v4 }
 0x229   : > { %4126 = vmatpush1.bf16.msra.mxu0 %v4125_v11  ;;  %4152 = vmatprep.subr.bf16.mxu1 %v4151_v22 }
 0x22a   : > { %4128 = vmatprep.subr.bf16.mxu0 %v4127_v14  ;;  %v1163_v6 = vunpack.c.0.s8 %v1162_v5 }
 0x22c   : > { %4154 = vmatpush3.bf16.msra.mxu1 %v4151_v22  ;;  %v1166_v7 = vsub.s32 %v1163_v6, %v985_v45 }
 0x22d   : > { %4130 = vmatpush1.bf16.msra.mxu0 %v4129_v20  ;;  %4156 = vmatprep.subr.bf16.mxu1 %v4155_v31 }
 0x22e   : > { %4132 = vmatprep.subr.bf16.mxu0 %v4131_v23  ;;  %v1167_v9 = vrot.slane %v3602_v8, %v1166_v7  ;;  %v1174_v11 = vrot.slane %v1160_v10, %v1166_v7 }
 0x230   : > { %4158 = vmatpush3.bf16.msra.mxu1 %v4155_v31  ;;  %v5236_v14 = vrot.slane %v1174_v11, %v5195_v48  ;;  %v5262_v38 = vrot.slane %v1167_v9, %v5195_v48 }
 0x231   : > { %4134 = vmatpush1.bf16.msra.mxu0 %v4133_v29  ;;  %4160 = vmatprep.subr.bf16.mxu1 %v4159_v37 }
 0x232   : > { %4136 = vmatprep.subr.bf16.mxu0 %v4135_v32 }
 0x234   : > { %4162 = vmatpush3.bf16.msra.mxu1 %v4159_v37 }
 0x235   : > { %4138 = vmatpush1.bf16.msra.mxu0 %v4137_v36  ;;  %4164 = vmatprep.subr.bf16.mxu1 %v4163_v40 }
 0x236   : > { %3848 = vmatprep.subr.mxu0 %v4694_v2 }
 0x238   : > { %1064 = vmatmul.mubr.f32.vlgmr.msra.gmra.mrb[0].mxu0 %v5148_v57  ;;  %4166 = vmatpush3.bf16.msra.mxu1 %v4163_v40 }
 0x239   : > { %1069 = vmatprep.mubr.f32.mxu0 %v4694_v2  ;;  %4168 = vmatprep.subr.bf16.mxu1 %v4167_v44 }
 0x23c   : > { %1070 = vmatmul.mubr.f32.gmra.mrb[2].mxu0 %v5184_v43  ;;  %4170 = vmatpush3.bf16.msra.mxu1 %v4167_v44 }
 0x23d   : > { %3843 = vmatprep.subr.mxu1 %v4694_v2  ;;  %3850 = vmatprep.mubr.msk.f32.mxu0 %vm4695_vm1, %v4694_v2 }
 0x23f   : > { %3841 = vmatmul.mubr.f32.vlgmr.msra.gmra.mrb[0].mxu1 %v5184_v43 }
 0x240   : > { %3845 = vmatprep.mubr.msk.f32.mxu1 %vm4695_vm1, %v4694_v2 }
 0x30b   : > { %v1065_v50 = vpop.f32.mrb[0].mxu0 }
 0x30c   : > { %v1067_v52 = vpop.f32.mrb[1].mxu0  ;;  %v5202_v56 = vadd.f32 %v1065_v50, %v987_v51 }
 0x30d   : > { %v5198_v53 = vadd.f32 %v1067_v52, %v991_v49 }
 0x30f   : > { %v1071_v54 = vpop.f32.mrb[2].mxu0  ;;  %3844 = vmatpush3.xpose.msk.msra.mxu1 %vm1175_vm2, %v5198_v53 }
 0x310   : > { %v1073_v0 = vpop.f32.mrb[3].mxu0  ;;  %3853 = vmatprep.subr.mxu1 %v4694_v2  ;;  %v5213_v60 = vadd.f32 %v1071_v54, %v987_v51 }
 0x311   : > { %v5205_v58 = vadd.f32 %v1073_v0, %v991_v49 }
 0x312   : > { %3846 = vmatmul.mubr.msk.f32.vlgmr.msra.gmra.mrb[2].mxu1 %vm1175_vm2, %v5202_v56  ;;  %v3842_v61 = vpop.f32.mrb[0].mxu1 }
 0x313   : > { %1595 = vrot.lane.b32.xlu1 %v5205_v58, %s4696_s3  ;;  %3849 = vmatpush3.xpose.msk.msra.mxu0 %vm1175_vm2, %v5205_v58  ;;  %v5222_v62 = vadd.f32 %v3842_v61, %v995_v59  ;;  %v1142_v63 = vpop.f32.mrb[1].mxu1 }
 0x314   : > { %3858 = vmatprep.subr.mxu0 %v4694_v2  ;;  %3855 = vmatprep.mubr.msk.f32.mxu1 %vm4695_vm1, %v4694_v2  ;;  %v5226_v1 = vadd.f32 %v1142_v63, %v995_v59 }
 0x316   : > { %3851 = vmatmul.mubr.msk.f32.vlgmr.msra.gmra.mrb[4].mxu0 %vm1175_vm2, %v5213_v60  ;;  %3854 = vmatpush3.msra.mxu1 %v5226_v1 }
 0x317   : > { %1593 = vrot.lane.b32.xlu1 %v5213_v60, %s4696_s3  ;;  %3860 = vmatprep.mubr.msk.f32.mxu0 %vm4695_vm1, %v4694_v2 }
 0x318   : > { %3859 = vmatpush3.msra.mxu0 %v5222_v62  ;;  %3863 = vmatprep.subr.mxu1 %v4694_v2 }
 0x319   : > { %3868 = vmatprep.subr.mxu0 %v4694_v2 }
 0x385   : > { %v1596_v27 = vpop.permute.xlu1 %1595 }
 0x389   : > { %v1594_v29 = vpop.permute.xlu1 %1593 }
 0x3e5   : > { %v1248_v12 = vpop.f32.mrb[2].mxu1 }
 0x3e6   : > { %v3847_v13 = vpop.f32.mrb[3].mxu1  ;;  %v1328_v37 = vmul.f32 0.35355338, %v1248_v12 }
 0x3e8   : > { %v1340_v39 = vadd.f32 %v5262_v38, %v1328_v37 }
 0x3e9   : > { %v1324_v15 = vpop.f32.mrb[4].mxu0 }
 0x3ea   : > { %v1329_v16 = vmul.f32 0.35355338, %v1324_v15  ;;  %v3852_v17 = vpop.f32.mrb[5].mxu0  ;;  %v1343_v40 = vsel %vm1342_vm3, %v1340_v39, -inf }
 0x3ec   : > { %v1341_v18 = vadd.f32 %v5236_v14, %v1329_v16 }
 0x3ee   : > { %v1346_v19 = vsel %vm1342_vm3, %v1341_v18, -inf }
 0x3ef   : > { %1347 = vmax.xlane.f32.xlu0 %v1346_v19 }
 0x47c   : > { %v1348_v20 = vpop.xlane.xlu0 %1347 }
 0x47d   : > { %v1350_v21 = vsub.f32 %v1341_v18, %v1348_v20 }
 0x47f   : > { %v1353_v22 = vmul.f32 1.442695, %v1350_v21 }
 0x481   : > { %4419 = vpow2.f32 %v1353_v22 }
 0x48b   : > { %v4420_v23 = vpop.eup %4419 }
 0x48c   : > { %v1358_v24 = vsel %vm1342_vm3, %v4420_v23, 0.0 }
 0x48d   : > { %1359 = vadd.xlane.f32.xlu0 %v1358_v24 }
 0x51a   : > { %v1360_v25 = vpop.xlane.xlu0 %1359 }
 0x51b   : > { %4421 = vrcp.f32 %v1360_v25 }
 0x525   : > { %v4422_v26 = vpop.eup %4421 }
 0x526   : > { %v1364_v28 = vmul.f32 %v4422_v26, %v4420_v23 }
 0x528   : > { %3861 = vmatmul.mubr.msk.f32.vlgmr.msra.gmra.mrb[6].mxu0 %vm1342_vm3, %v1364_v28 }
 0x529   : > { %3869 = vmatpush3.xpose.msk.msra.mxu0 %vm1175_vm2, %v1596_v27  ;;  %3870 = vmatprep.mubr.msk.f32.mxu0 %vm4695_vm1, %v4694_v2 }
 0x52a   : > { %3878 = vmatprep.subr.mxu0 %v4694_v2 }
 0x52c   : > { %3871 = vmatmul.mubr.msk.f32.vlgmr.msra.gmra.mrb[8].mxu0 %vm1175_vm2, %v1594_v29 }
 0x52d   : > { %3880 = vmatprep.mubr.msk.f32.mxu0 %vm4695_vm1, %v4694_v2 }
 0x5fb   : > { %v5249_v30 = vpop.f32.mrb[6].mxu0 }
 0x5fc   : > { %v3862_v31 = vpop.f32.mrb[7].mxu0 }
 0x5ff   : > { %v1667_v32 = vpop.f32.mrb[8].mxu0 }
 0x600   : > { %v1672_v33 = vmul.f32 0.35355338, %v1667_v32  ;;  %v3872_v34 = vpop.f32.mrb[9].mxu0 }
 0x602   : > { %v1674_v35 = vadd.f32 %v1672_v33, %v5236_v14 }
 0x604   : > { %v1678_v36 = vsel %vm1342_vm3, %v1674_v35, -inf }
 0x605   : > { %1679 = vmax.xlane.f32.xlu0 %v1678_v36 }
 0x61b   : > { %1775 = vrot.lane.b32.xlu0 %v5222_v62, %s4696_s3 }
 0x61f   : > { %2020 = vrot.lane.b32.xlu0 %v5198_v53, %s4698_s4 }
 0x623   : > { %2018 = vrot.lane.b32.xlu0 %v5202_v56, %s4698_s4 }
 0x627   : > { %2098 = vrot.lane.b32.xlu0 %v5205_v58, %s4698_s4 }
 0x646   : > { %1344 = vmax.xlane.f32.xlu0 %v1343_v40 }
 0x65c   : > { %1517 = vrot.lane.b32.xlu0 %v5198_v53, %s4696_s3 }
 0x692   : > { %v1680_v41 = vpop.xlane.xlu0 %1679 }
 0x693   : > { %v1682_v42 = vsub.f32 %v1674_v35, %v1680_v41 }
 0x695   : > { %v1685_v44 = vmul.f32 1.442695, %v1682_v42 }
 0x696   : > { %v1776_v45 = vpop.permute.xlu0 %1775 }
 0x697   : > { %4423 = vpow2.f32 %v1685_v44  ;;  %3879 = vmatpush3.msra.mxu0 %v1776_v45 }
 0x698   : > { %3905 = vmatprep.subr.mxu0 %v4694_v2 }
 0x69a   : > { %v2021_v48 = vpop.permute.xlu0 %2020 }
 0x69e   : > { %v2019_v49 = vpop.permute.xlu0 %2018 }
 0x6a1   : > { %v4424_v46 = vpop.eup %4423 }
 0x6a2   : > { %v1690_v47 = vsel %vm1342_vm3, %v4424_v46, 0.0  ;;  %v2099_v50 = vpop.permute.xlu0 %2098 }
 0x6a3   : > { %1691 = vadd.xlane.f32.xlu1 %v1690_v47 }
 0x6b4   : > { %2096 = vrot.lane.b32.xlu1 %v5213_v60, %s4698_s4 }
 0x6d3   : > { %v1345_v51 = vpop.xlane.xlu0 %1344 }
 0x6d4   : > { %v1349_v52 = vsub.f32 %v1340_v39, %v1345_v51 }
 0x6d6   : > { %v1351_v54 = vmul.f32 1.442695, %v1349_v52 }
 0x6d7   : > { %v1518_v8 = vpop.permute.xlu0 %1517 }
 0x6d8   : > { %4425 = vpow2.f32 %v1351_v54 }
 0x6e2   : > { %v4426_v55 = vpop.eup %4425 }
 0x6e3   : > { %v1355_v0 = vsel %vm1342_vm3, %v4426_v55, 0.0 }
 0x6e4   : > { %1356 = vadd.xlane.f32.xlu1 %v1355_v0 }
 0x6f5   : > { %1515 = vrot.lane.b32.xlu1 %v5202_v56, %s4696_s3 }
 0x730   : > { %v1692_v59 = vpop.xlane.xlu1 %1691 }
 0x731   : > { %4427 = vrcp.f32 %v1692_v59 }
 0x734   : > { %v2097_v4 = vpop.permute.xlu1 %2096 }
 0x73b   : > { %v4428_v61 = vpop.eup %4427 }
 0x73c   : > { %v1696_v63 = vmul.f32 %v4428_v61, %v4424_v46 }
 0x73e   : > { %3881 = vmatmul.mubr.msk.f32.vlgmr.msra.gmra.mrb[10].mxu0 %vm1342_vm3, %v1696_v63 }
 0x73f   : > { %3906 = vmatpush3.xpose.msk.msra.mxu0 %vm1175_vm2, %v2021_v48  ;;  %3907 = vmatprep.mubr.msk.f32.mxu0 %vm4695_vm1, %v4694_v2 }
 0x740   : > { %3910 = vmatprep.subr.mxu0 %v4694_v2 }
 0x742   : > { %3908 = vmatmul.mubr.msk.f32.vlgmr.msra.gmra.mrb[12].mxu0 %vm1175_vm2, %v2019_v49 }
 0x743   : > { %3911 = vmatpush3.xpose.msk.msra.mxu0 %vm1175_vm2, %v2099_v50  ;;  %3912 = vmatprep.mubr.msk.f32.mxu0 %vm4695_vm1, %v4694_v2 }
 0x744   : > { %3915 = vmatprep.subr.mxu0 %v4694_v2 }
 0x746   : > { %3913 = vmatmul.mubr.msk.f32.vlgmr.msra.gmra.mrb[14].mxu0 %vm1175_vm2, %v2097_v4 }
 0x747   : > { %3917 = vmatprep.mubr.msk.f32.mxu0 %vm4695_vm1, %v4694_v2 }
 0x771   : > { %v1357_v5 = vpop.xlane.xlu1 %1356 }
 0x772   : > { %4429 = vrcp.f32 %v1357_v5  ;;  %v3615_v5 = vld [vmem:[%s5075_s10 + $0x20] sm:$0xff] }
 0x775   : > { %v1516_v9 = vpop.permute.xlu1 %1515 }
 0x77c   : > { %v4430_v6 = vpop.eup %4429 }
 0x77d   : > { %v1363_v7 = vmul.f32 %v4430_v6, %v4426_v55  ;;  %v3616_v6 = vld [vmem:[%s5075_s10 + $0x28] sm:$0xff] }
 0x77f   : > { %3856 = vmatmul.mubr.msk.f32.vlgmr.msra.gmra.mrb[4].mxu1 %vm1342_vm3, %v1363_v7  ;;  %v3617_v7 = vld [vmem:[%s5075_s10 + $0x30] sm:$0xff] }
 0x780   : > { %3864 = vmatpush3.xpose.msk.msra.mxu1 %vm1175_vm2, %v1518_v8  ;;  %3865 = vmatprep.mubr.msk.f32.mxu1 %vm4695_vm1, %v4694_v2  ;;  %v4171_v8 = vpack.c.bf16 %v3616_v6, %v3615_v5  ;;  %v3647_v5 = vld [vmem:[%s5629_s14] ss:$0 sm:$0xff] }
 0x781   : > { %3873 = vmatprep.subr.mxu1 %v4694_v2 }
 0x783   : > { %3866 = vmatmul.mubr.msk.f32.vlgmr.msra.gmra.mrb[6].mxu1 %vm1175_vm2, %v1516_v9  ;;  %v3618_v9 = vld [vmem:[%s5075_s10 + $0x38] sm:$0xff] }
 0x784   : > { %3875 = vmatprep.mubr.msk.f32.mxu1 %vm4695_vm1, %v4694_v2 }
 0x811   : > { %v5296_v10 = vpop.f32.mrb[10].mxu0 }
 0x812   : > { %v3882_v11 = vpop.f32.mrb[11].mxu0 }
 0x813   : > { %v4175_v11 = vpack.c.bf16 %v3618_v9, %v3617_v7 }
 0x815   : > { %v2092_v12 = vpop.f32.mrb[12].mxu0 }
 0x816   : > { %v2174_v13 = vmul.f32 0.35355338, %v2092_v12  ;;  %v3909_v15 = vpop.f32.mrb[13].mxu0  ;;  %v1511_v12 = vld [vmem:[%s5075_s10] sm:$0xff] }
 0x818   : > { %v2176_v16 = vadd.f32 %v2174_v13, %v5262_v38  ;;  %v1512_v13 = vld [vmem:[%s5075_s10 + $0x8] sm:$0xff] }
 0x819   : > { %v2170_v17 = vpop.f32.mrb[14].mxu0  ;;  %v4179_v15 = vpack.c.bf16 %v1512_v13, %v1511_v12  ;;  %v2915_v13 = vld [vmem:[%s5053_s19] sm:$0xff] }
 0x81a   : > { %v2175_v18 = vmul.f32 0.35355338, %v2170_v17  ;;  %v3914_v19 = vpop.f32.mrb[15].mxu0  ;;  %v2178_v20 = vsel %vm1342_vm3, %v2176_v16, -inf }
 0x81b   : > { %2179 = vmax.xlane.f32.xlu0 %v2178_v20 }
 0x81c   : > { %v2177_v21 = vadd.f32 %v2175_v18, %v5236_v14 }
 0x81e   : > { %v2181_v22 = vsel %vm1342_vm3, %v2177_v21, -inf }
 0x81f   : > { %2182 = vmax.xlane.f32.xlu1 %v2181_v22 }
 0x830   : > { %2276 = vrot.lane.b32.xlu1 %v5222_v62, %s4698_s4 }
 0x831   : > { %2200 = vrot.lane.b32.xlu0 %v5226_v1, %s4698_s4 }
 0x834   : > { %2520 = vrot.lane.b32.xlu1 %v5205_v58, %s4699_s1 }
 0x852   : > { %v5308_v23 = vpop.f32.mrb[4].mxu1 }
 0x853   : > { %v3857_v24 = vpop.f32.mrb[5].mxu1 }
 0x856   : > { %v1589_v25 = vpop.f32.mrb[6].mxu1 }
 0x857   : > { %v1671_v26 = vmul.f32 0.35355338, %v1589_v25  ;;  %v3867_v27 = vpop.f32.mrb[7].mxu1 }
 0x859   : > { %v1673_v28 = vadd.f32 %v1671_v26, %v5262_v38 }
 0x85b   : > { %v1675_v29 = vsel %vm1342_vm3, %v1673_v28, -inf }
 0x85c   : > { %1676 = vmax.xlane.f32.xlu1 %v1675_v29 }
 0x8a8   : > { %v2180_v31 = vpop.xlane.xlu0 %2179 }
 0x8a9   : > { %v2184_v32 = vsub.f32 %v2176_v16, %v2180_v31 }
 0x8ab   : > { %v2186_v33 = vmul.f32 1.442695, %v2184_v32  ;;  %v1513_v32 = vld [vmem:[%s5075_s10 + $0x10] sm:$0xff] }
 0x8ac   : > { %v2201_v34 = vpop.permute.xlu0 %2200  ;;  %v2183_v36 = vpop.xlane.xlu1 %2182 }
 0x8ad   : > { %4431 = vpow2.f32 %v2186_v33  ;;  %3916 = vmatpush3.msra.mxu0 %v2201_v34  ;;  %v2185_v37 = vsub.f32 %v2177_v21, %v2183_v36  ;;  %v1514_v33 = vld [vmem:[%s5075_s10 + $0x18] sm:$0xff]  ;;  %v3630_v36 = vld [vmem:[%s5075_s10 + $0x48] sm:$0xff] }
 0x8ae   : > { %3920 = vmatprep.subr.mxu0 %v4694_v2 }
 0x8af   : > { %v2188_v39 = vmul.f32 1.442695, %v2185_v37  ;;  %v3631_v37 = vld [vmem:[%s5075_s10 + $0x50] sm:$0xff] }
 0x8b0   : > { %v2277_v42 = vpop.permute.xlu1 %2276 }
 0x8b1   : > { %4433 = vpow2.f32 %v2188_v39  ;;  %v3632_v39 = vld [vmem:[%s5075_s10 + $0x58] sm:$0xff] }
 0x8b4   : > { %v2521_v44 = vpop.permute.xlu1 %2520 }
 0x8b7   : > { %v4432_v58 = vpop.eup %4431 }
 0x8b8   : > { %v2190_v35 = vsel %vm1342_vm3, %v4432_v58, 0.0 }
 0x8b9   : > { %2191 = vadd.xlane.f32.xlu0 %v2190_v35 }
 0x8bb   : > { %v4434_v40 = vpop.eup %4433 }
 0x8bc   : > { %v2193_v41 = vsel %vm1342_vm3, %v4434_v40, 0.0 }
 0x8cf   : > { %2442 = vrot.lane.b32.xlu0 %v5198_v53, %s4699_s1 }
 0x8e9   : > { %v1677_v45 = vpop.xlane.xlu1 %1676 }
 0x8ea   : > { %v1681_v46 = vsub.f32 %v1673_v28, %v1677_v45 }
 0x8ec   : > { %v1683_v47 = vmul.f32 1.442695, %v1681_v46 }
 0x8ee   : > { %2194 = vadd.xlane.f32.xlu0 %v2193_v41  ;;  %4435 = vpow2.f32 %v1683_v47 }
 0x8f8   : > { %v4436_v53 = vpop.eup %4435 }
 0x8f9   : > { %v1687_v48 = vsel %vm1342_vm3, %v4436_v53, 0.0 }
 0x904   : > { %2440 = vrot.lane.b32.xlu0 %v5202_v56, %s4699_s1 }
 0x908   : > { %2518 = vrot.lane.b32.xlu0 %v5213_v60, %s4699_s1 }
 0x927   : > { %1688 = vadd.xlane.f32.xlu0 %v1687_v48  ;;  %v3641_v48 = vld [vmem:[%s5075_s10 + $0x60] sm:$0xff] }
 0x93d   : > { %1698 = vrot.lane.b32.xlu0 %v5226_v1, %s4696_s3 }
 0x941   : > { %2698 = vrot.lane.b32.xlu0 %v5222_v62, %s4699_s1 }
 0x946   : > { %v2192_v49 = vpop.xlane.xlu0 %2191 }
 0x947   : > { %4437 = vrcp.f32 %v2192_v49  ;;  %v3642_v49 = vld [vmem:[%s5075_s10 + $0x68] sm:$0xff] }
 0x94a   : > { %v2443_v60 = vpop.permute.xlu0 %2442 }
 0x951   : > { %v4438_v56 = vpop.eup %4437 }
 0x952   : > { %v2198_v50 = vmul.f32 %v4438_v56, %v4432_v58  ;;  %v4183_v58 = vpack.c.bf16 %v1514_v33, %v1513_v32  ;;  %v2921_v33 = vld [vmem:[%s5053_s19 + $0x30] sm:$0xff] }
 0x954   : > { %3918 = vmatmul.mubr.msk.f32.vlgmr.msra.gmra.mrb[16].mxu0 %vm1342_vm3, %v2198_v50  ;;  %v4195_v50 = vpack.c.bf16 %v3642_v49, %v3641_v48  ;;  %v3648_v49 = vld [vmem:[%s861_s16] ss:$0 sm:$0xff] }
 0x955   : > { %3921 = vmatpush3.msra.mxu0 %v2277_v42  ;;  %3922 = vmatprep.mubr.msk.f32.mxu0 %vm4695_vm1, %v4694_v2 }
 0x956   : > { %3936 = vmatprep.subr.mxu0 %v4694_v2 }
 0x97b   : > { %v2195_v51 = vpop.xlane.xlu0 %2194 }
 0x97c   : > { %4439 = vrcp.f32 %v2195_v51 }
 0x97f   : > { %v2441_v62 = vpop.permute.xlu0 %2440 }
 0x983   : > { %v2519_v55 = vpop.permute.xlu0 %2518 }
 0x986   : > { %v4440_v52 = vpop.eup %4439 }
 0x987   : > { %v2199_v54 = vmul.f32 %v4440_v52, %v4434_v40  ;;  %v4191_v40 = vpack.c.bf16 %v3632_v39, %v3631_v37  ;;  %v2926_v37 = vld [vmem:[%s5053_s19 + $0x58] sm:$0xff] }
 0x989   : > { %3923 = vmatmul.mubr.msk.f32.vlgmr.msra.gmra.mrb[18].mxu0 %vm1342_vm3, %v2199_v54 }
 0x98a   : > { %3937 = vmatpush3.xpose.msk.msra.mxu0 %vm1175_vm2, %v2443_v60  ;;  %3938 = vmatprep.mubr.msk.f32.mxu0 %vm4695_vm1, %v4694_v2 }
 0x98b   : > { %3941 = vmatprep.subr.mxu0 %v4694_v2 }
 0x98d   : > { %3939 = vmatmul.mubr.msk.f32.vlgmr.msra.gmra.mrb[20].mxu0 %vm1175_vm2, %v2441_v62  ;;  %v3643_v62 = vld [vmem:[%s5075_s10 + $0x70] sm:$0xff] }
 0x98e   : > { %3942 = vmatpush3.xpose.msk.msra.mxu0 %vm1175_vm2, %v2521_v44  ;;  %3943 = vmatprep.mubr.msk.f32.mxu0 %vm4695_vm1, %v4694_v2 }
 0x98f   : > { %3951 = vmatprep.subr.mxu0 %v4694_v2 }
 0x991   : > { %3944 = vmatmul.mubr.msk.f32.vlgmr.msra.gmra.mrb[22].mxu0 %vm1175_vm2, %v2519_v55  ;;  %v3644_v55 = vld [vmem:[%s5075_s10 + $0x78] sm:$0xff] }
 0x992   : > { %3953 = vmatprep.mubr.msk.f32.mxu0 %vm4695_vm1, %v4694_v2 }
 0x9b4   : > { %v1689_v0 = vpop.xlane.xlu0 %1688 }
 0x9b5   : > { %4441 = vrcp.f32 %v1689_v0  ;;  %v4199_v0 = vpack.c.bf16 %v3644_v55, %v3643_v62  ;;  %v3031_v55 = vld [vmem:[%s5059_s29] sm:$0xff] }
 0x9b8   : > { %v1699_v59 = vpop.permute.xlu0 %1698 }
 0x9b9   : > { %3874 = vmatpush3.msra.mxu1 %v1699_v59 }
 0x9ba   : > { %4172 = vmatprep.subr.bf16.mxu1 %v4171_v8 }
 0x9bc   : > { %v2699_v61 = vpop.permute.xlu0 %2698 }
 0x9bd   : > { %3952 = vmatpush3.msra.mxu0 %v2699_v61 }
 0x9bf   : > { %v4442_v63 = vpop.eup %4441 }
 0x9c0   : > { %v1695_v4 = vmul.f32 %v4442_v63, %v4436_v53 }
 0x9c2   : > { %3876 = vmatmul.mubr.msk.f32.vlgmr.msra.gmra.mrb[8].mxu1 %vm1342_vm3, %v1695_v4 }
 0x9c3   : > { %4174 = vmatpush3.bf16.msra.mxu1 %v4171_v8 }
 0x9c4   : > { %4176 = vmatprep.subr.bf16.mxu1 %v4175_v11 }
 0x9c7   : > { %4178 = vmatpush3.bf16.msra.mxu1 %v4175_v11 }
 0x9c8   : > { %4180 = vmatprep.subr.bf16.mxu1 %v4179_v15 }
 0xa27   : > { %v2272_v16 = vpop.f32.mrb[16].mxu0 }
 0xa28   : > { %v3919_v17 = vpop.f32.mrb[17].mxu0 }
 0xa5c   : > { %v2348_v18 = vpop.f32.mrb[18].mxu0 }
 0xa5d   : > { %v3924_v19 = vpop.f32.mrb[19].mxu0 }
 0xa60   : > { %v2514_v20 = vpop.f32.mrb[20].mxu0 }
 0xa61   : > { %v2596_v21 = vmul.f32 0.35355338, %v2514_v20  ;;  %v3940_v22 = vpop.f32.mrb[21].mxu0 }
 0xa63   : > { %v2598_v24 = vadd.f32 %v2596_v21, %v5262_v38  ;;  %v3629_v38 = vld [vmem:[%s5075_s10 + $0x40] sm:$0xff] }
 0xa64   : > { %v2592_v25 = vpop.f32.mrb[22].mxu0 }
 0xa65   : > { %v2597_v26 = vmul.f32 0.35355338, %v2592_v25  ;;  %v3945_v27 = vpop.f32.mrb[23].mxu0  ;;  %v2600_v28 = vsel %vm1342_vm3, %v2598_v24, -inf }
 0xa66   : > { %2601 = vmax.xlane.f32.xlu1 %v2600_v28 }
 0xa67   : > { %v2599_v29 = vadd.f32 %v2597_v26, %v5236_v14  ;;  %v4187_v14 = vpack.c.bf16 %v3630_v36, %v3629_v38  ;;  %v2924_v38 = vld [vmem:[%s5053_s19 + $0x48] sm:$0xff] }
 0xa69   : > { %v2603_v31 = vsel %vm1342_vm3, %v2599_v29, -inf }
 0xa6a   : > { %2604 = vmax.xlane.f32.xlu1 %v2603_v31  ;;  %v2920_v31 = vld [vmem:[%s5053_s19 + $0x28] sm:$0xff] }
 0xa95   : > { %v1770_v34 = vpop.f32.mrb[8].mxu1 }
 0xa96   : > { %v3877_v35 = vpop.f32.mrb[9].mxu1  ;;  %3891 = vmatprep.mubr.msk.f32.mxu1 %vm1175_vm2, %v1770_v34  ;;  %v2922_v34 = vld [vmem:[%s5053_s19 + $0x38] sm:$0xff] }
 0xa97   : > { %3892 = vmatmul.mubr.msk.f32.vlgmr.msra.gmra.mrb[10].mxu1 %vm1175_vm2, %v5296_v10  ;;  %v2923_v35 = vld [vmem:[%s5053_s19 + $0x40] sm:$0xff] }
 0xa98   : > { %4182 = vmatpush3.bf16.msra.mxu1 %v4179_v15  ;;  %3902 = vmatprep.mubr.msk.f32.mxu1 %vm1175_vm2, %v5308_v23  ;;  %v2916_v15 = vld [vmem:[%s5053_s19 + $0x8] sm:$0xff]  ;;  %v4219_v36 = vpack.c.bf16 %v2924_v38, %v2923_v35 }
 0xa99   : > { %4184 = vmatprep.subr.bf16.mxu1 %v4183_v58  ;;  %v4203_v17 = vpack.c.bf16 %v2916_v15, %v2915_v13  ;;  %v3040_v13 = vld [vmem:[%s5059_s29 + $0x48] sm:$0xff]  ;;  %v3041_v15 = vld [vmem:[%s5059_s29 + $0x50] sm:$0xff] }
 0xa9b   : > { %4204 = vmatprep.subr.bf16.mxu0 %v4203_v17 }
 0xa9c   : > { %4186 = vmatpush3.bf16.msra.mxu1 %v4183_v58  ;;  %v4215_v58 = vpack.c.bf16 %v2922_v34, %v2921_v33 }
 0xa9d   : > { %4188 = vmatprep.subr.bf16.mxu1 %v4187_v14 }
 0xa9f   : > { %3903 = vmatmul.mubr.msk.f32.vlgmr.msra.gmra.mrb[10].mxu1 %vm1175_vm2, %v5249_v30 }
 0xaa0   : > { %4190 = vmatpush3.bf16.msra.mxu1 %v4187_v14  ;;  %3933 = vmatprep.mubr.msk.f32.mxu1 %vm1175_vm2, %v2272_v16  ;;  %v2917_v16 = vld [vmem:[%s5053_s19 + $0x10] sm:$0xff] }
 0xaa1   : > { %4192 = vmatprep.subr.bf16.mxu1 %v4191_v40  ;;  %v2925_v14 = vld [vmem:[%s5053_s19 + $0x50] sm:$0xff] }
 0xaa2   : > { %v4223_v39 = vpack.c.bf16 %v2926_v37, %v2925_v14 }
 0xaa4   : > { %4194 = vmatpush3.bf16.msra.mxu1 %v4191_v40  ;;  %v2927_v40 = vld [vmem:[%s5053_s19 + $0x60] sm:$0xff] }
 0xaa5   : > { %3946 = vmatprep.subr.mxu1 %v4694_v2 }
 0xaa7   : > { %3934 = vmatmul.mubr.msk.f32.vlgmr.msra.gmra.mrb[10].mxu1 %vm1175_vm2, %v2348_v18  ;;  %v2918_v18 = vld [vmem:[%s5053_s19 + $0x18] sm:$0xff] }
 0xaa8   : > { %3948 = vmatprep.mubr.msk.f32.mxu1 %vm4695_vm1, %v4694_v2  ;;  %v4207_v19 = vpack.c.bf16 %v2918_v18, %v2917_v16 }
 0xaf3   : > { %v2602_v10 = vpop.xlane.xlu1 %2601 }
 0xaf4   : > { %v2606_v23 = vsub.f32 %v2598_v24, %v2602_v10  ;;  %v2928_v10 = vld [vmem:[%s5053_s19 + $0x68] sm:$0xff] }
 0xaf6   : > { %v2608_v41 = vmul.f32 1.442695, %v2606_v23  ;;  %v4227_v23 = vpack.c.bf16 %v2928_v10, %v2927_v40 }
 0xaf7   : > { %v2605_v42 = vpop.xlane.xlu1 %2604 }
 0xaf8   : > { %4443 = vpow2.f32 %v2608_v41  ;;  %v2607_v30 = vsub.f32 %v2599_v29, %v2605_v42  ;;  %v2919_v29 = vld [vmem:[%s5053_s19 + $0x20] sm:$0xff]  ;;  %v2929_v41 = vld [vmem:[%s5053_s19 + $0x70] sm:$0xff]  ;;  %v2930_v42 = vld [vmem:[%s5053_s19 + $0x78] sm:$0xff] }
 0xaf9   : > { %v4211_v32 = vpack.c.bf16 %v2920_v31, %v2919_v29 }
 0xafa   : > { %v2610_v44 = vmul.f32 1.442695, %v2607_v30  ;;  %v4231_v30 = vpack.c.bf16 %v2930_v42, %v2929_v41 }
 0xafc   : > { %4445 = vpow2.f32 %v2610_v44 }
 0xb02   : > { %v4444_v45 = vpop.eup %4443 }
 0xb03   : > { %v2612_v46 = vsel %vm1342_vm3, %v4444_v45, 0.0 }
 0xb04   : > { %2613 = vadd.xlane.f32.xlu1 %v2612_v46 }
 0xb06   : > { %v4446_v47 = vpop.eup %4445 }
 0xb07   : > { %v2615_v53 = vsel %vm1342_vm3, %v4446_v47, 0.0 }
 0xb08   : > { %2616 = vadd.xlane.f32.xlu1 %v2615_v53 }
 0xb19   : > { %2622 = vrot.lane.b32.xlu1 %v5226_v1, %s4699_s1  ;;  %s5637_s1 = sld [smem:[#allocation38_spill]] (!%p3654_p0) }
 0xb91   : > { %v2614_v2 = vpop.xlane.xlu1 %2613 }
 0xb92   : > { %4447 = vrcp.f32 %v2614_v2 }
 0xb95   : > { %v2617_v56 = vpop.xlane.xlu1 %2616 }
 0xb96   : > { %4449 = vrcp.f32 %v2617_v56 }
 0xb99   : > { %v2623_v60 = vpop.permute.xlu1 %2622 }
 0xb9a   : > { %3947 = vmatpush3.msra.mxu1 %v2623_v60 }
 0xb9b   : > { %4196 = vmatprep.subr.bf16.mxu1 %v4195_v50 }
 0xb9c   : > { %v4448_v51 = vpop.eup %4447 }
 0xb9d   : > { %v2620_v52 = vmul.f32 %v4448_v51, %v4444_v45 }
 0xb9f   : > { %3949 = vmatmul.mubr.msk.f32.vlgmr.msra.gmra.mrb[12].mxu1 %vm1342_vm3, %v2620_v52 }
 0xba0   : > { %v4450_v54 = vpop.eup %4449  ;;  %4198 = vmatpush3.bf16.msra.mxu1 %v4195_v50  ;;  %v3649_v50 = vld [vmem:[%s864_s11] ss:$0 sm:$0xff] }
 0xba1   : > { %v2621_v1 = vmul.f32 %v4450_v54, %v4446_v47  ;;  %4200 = vmatprep.subr.bf16.mxu1 %v4199_v0 }
 0xba3   : > { %3954 = vmatmul.mubr.msk.f32.vlgmr.msra.gmra.mrb[24].mxu0 %vm1342_vm3, %v2621_v1 }
 0xba4   : > { %4202 = vmatpush3.bf16.msra.mxu1 %v4199_v0  ;;  %4206 = vmatpush3.bf16.msra.mxu0 %v4203_v17  ;;  %v3032_v0 = vld [vmem:[%s5059_s29 + $0x8] sm:$0xff]  ;;  %v3042_v17 = vld [vmem:[%s5059_s29 + $0x58] sm:$0xff] }
 0xba5   : > { %4208 = vmatprep.subr.bf16.mxu0 %v4207_v19  ;;  %v4255_v18 = vpack.c.bf16 %v3042_v17, %v3041_v15  ;;  %v3179_v17 = vld [vmem:[#allocation9] sm:$0xff] (!%p3654_p0) }
 0xba8   : > { %4210 = vmatpush3.bf16.msra.mxu0 %v4207_v19  ;;  %v3043_v19 = vld [vmem:[%s5059_s29 + $0x60] sm:$0xff] }
 0xba9   : > { %4212 = vmatprep.subr.bf16.mxu0 %v4211_v32 }
 0xbac   : > { %4214 = vmatpush3.bf16.msra.mxu0 %v4211_v32 }
 0xbad   : > { %4216 = vmatprep.subr.bf16.mxu0 %v4215_v58 }
 0xbb0   : > { %4218 = vmatpush3.bf16.msra.mxu0 %v4215_v58 }
 0xbb1   : > { %4220 = vmatprep.subr.bf16.mxu0 %v4219_v36 }
 0xbb4   : > { %4222 = vmatpush3.bf16.msra.mxu0 %v4219_v36 }
 0xbb5   : > { %4224 = vmatprep.subr.bf16.mxu0 %v4223_v39 }
 0xbb8   : > { %4226 = vmatpush3.bf16.msra.mxu0 %v4223_v39 }
 0xbb9   : > { %4228 = vmatprep.subr.bf16.mxu0 %v4227_v23 }
 0xbbc   : > { %4230 = vmatpush3.bf16.msra.mxu0 %v4227_v23 }
 0xbbd   : > { %4232 = vmatprep.subr.bf16.mxu0 %v4231_v30 }
 0xbc0   : > { %4234 = vmatpush3.bf16.msra.mxu0 %v4231_v30 }
 0xc72   : > { %v2694_v59 = vpop.f32.mrb[12].mxu1 }
 0xc73   : > { %v3950_v61 = vpop.f32.mrb[13].mxu1  ;;  %3964 = vmatprep.mubr.msk.f32.mxu1 %vm1175_vm2, %v2694_v59  ;;  %v4235_v59 = vpack.c.bf16 %v3032_v0, %v3031_v55 }
 0xc74   : > { %v3033_v61 = vld [vmem:[%s5059_s29 + $0x10] sm:$0xff] }
 0xc75   : > { %4236 = vmatprep.subr.bf16.mxu1 %v4235_v59 }
 0xc76   : > { %v2770_v63 = vpop.f32.mrb[24].mxu0 }
 0xc77   : > { %v3955_v4 = vpop.f32.mrb[25].mxu0  ;;  %3965 = vmatmul.mubr.msk.f32.vlgmr.msra.gmra.mrb[10].mxu1 %vm1175_vm2, %v2770_v63  ;;  %v3034_v63 = vld [vmem:[%s5059_s29 + $0x18] sm:$0xff] }
 0xc78   : > { %4238 = vmatpush3.bf16.msra.mxu1 %v4235_v59  ;;  %v4239_v4 = vpack.c.bf16 %v3034_v63, %v3033_v61 }
 0xc7a   : > { %4240 = vmatprep.subr.bf16.mxu1 %v4239_v4 }
 0xc7c   : > { %4242 = vmatpush3.bf16.msra.mxu1 %v4239_v4 }
 0xd4a   : > { %v3966_v6 = vpop.f32.mrb[10].mxu1 }
 0xd4b   : > { %v2870_v7 = vadd.f32 %v3966_v6, %v3647_v5  ;;  %v2851_v8 = vpop.f32.mrb[11].mxu1  ;;  %v3036_v6 = vld [vmem:[%s5059_s29 + $0x28] sm:$0xff] }
 0xd4c   : > { %v2869_v9 = vadd.f32 %v3647_v5, %v2851_v8  ;;  %v3035_v5 = vld [vmem:[%s5059_s29 + $0x20] sm:$0xff]  ;;  %v3037_v8 = vld [vmem:[%s5059_s29 + $0x30] sm:$0xff] }
 0xd4d   : > { %v2872_v11 = vadd.f32 %v2870_v7, %v5184_v43  ;;  %v4243_v7 = vpack.c.bf16 %v3036_v6, %v3035_v5 }
 0xd4e   : > { %v2871_v12 = vadd.f32 %v2869_v9, %v5148_v57  ;;  %v3038_v9 = vld [vmem:[%s5059_s29 + $0x38] sm:$0xff] }
 0xd4f   : > { %2877 = vadd.xlane.f32.xlu1 %v2872_v11  ;;  %4244 = vmatprep.subr.bf16.mxu1 %v4243_v7 }
 0xd50   : > { %2875 = vadd.xlane.f32.xlu0 %v2871_v12  ;;  %4246 = vmatpush3.bf16.msra.mxu1 %v4243_v7  ;;  %v3652_v7 = vld [vmem:[%s873_s9] ss:$0 sm:$0xff] }
 0xddc   : > { %v2878_v20 = vpop.xlane.xlu1 %2877 }
 0xddd   : > { %v2880_v21 = vmul.f32 0.03125, %v2878_v20  ;;  %v2876_v43 = vpop.xlane.xlu0 %2875  ;;  %v3044_v20 = vld [vmem:[%s5059_s29 + $0x68] sm:$0xff] }
 0xdde   : > { %v2879_v57 = vmul.f32 0.03125, %v2876_v43  ;;  %v3045_v43 = vld [vmem:[%s5059_s29 + $0x70] sm:$0xff] }
 0xddf   : > { %v2882_v22 = vsub.f32 %v2872_v11, %v2880_v21  ;;  %v4247_v11 = vpack.c.bf16 %v3038_v9, %v3037_v8  ;;  %v4259_v21 = vpack.c.bf16 %v3044_v20, %v3043_v19  ;;  %v3181_v19 = vld [vmem:[#allocation9 + $0x10] sm:$0xff] (!%p3654_p0)  ;;  %v4700_v20 = vmov (!%p3654_p0), 0.0|0.0  }
 0xde0   : > { %v2881_v24 = vsub.f32 %v2871_v12, %v2879_v57  ;;  %v3039_v12 = vld [vmem:[%s5059_s29 + $0x40] sm:$0xff]  ;;  %v3046_v57 = vld [vmem:[%s5059_s29 + $0x78] sm:$0xff]  ;;  %4267 = vmatprep.subr.bf16.mxu0 (!%p3654_p0), %v4700_v20 }
 0xde1   : > { %v2884_v26 = vmul.f32 %v5082_v3, %v2882_v22  ;;  %4248 = vmatprep.subr.bf16.mxu1 %v4247_v11  ;;  %v4251_v16 = vpack.c.bf16 %v3040_v13, %v3039_v12  ;;  %v4263_v22 = vpack.c.bf16 %v3046_v57, %v3045_v43  ;;  %v3182_v43 = vld [vmem:[#allocation9 + $0x18] sm:$0xff] (!%p3654_p0)  ;;  %v4702_v57 = vmov (!%p3654_p0), 0.0  }
 0xde2   : > { %v2883_v25 = vmul.f32 %v5082_v3, %v2881_v24  ;;  %4250 = vmatpush3.bf16.msra.mxu1 %v4247_v11  ;;  %v3650_v24 = vld [vmem:[%s867_s24] ss:$0 sm:$0xff] }
 0xde3   : > { %v2886_v28 = vmul.f32 %v2884_v26, %v2884_v26  ;;  %4252 = vmatprep.subr.bf16.mxu1 %v4251_v16 }
 0xde4   : > { %v2885_v27 = vmul.f32 %v2883_v25, %v2883_v25 }
 0xde6   : > { %2887 = vadd.xlane.f32.xlu0 %v2885_v27  ;;  %4254 = vmatpush3.bf16.msra.mxu1 %v4251_v16 }
 0xde7   : > { %4256 = vmatprep.subr.bf16.mxu1 %v4255_v18 }
 0xdea   : > { %2889 = vadd.xlane.f32.xlu0 %v2886_v28  ;;  %4258 = vmatpush3.bf16.msra.mxu1 %v4255_v18  ;;  %v3180_v18 = vld [vmem:[#allocation9 + $0x8] sm:$0xff] (!%p3654_p0) }
 0xdeb   : > { %4260 = vmatprep.subr.bf16.mxu1 %v4259_v21 }
 0xdee   : > { %4262 = vmatpush3.bf16.msra.mxu1 %v4259_v21  ;;  %v4268_v21 = vpack.c.bf16 (!%p3654_p0), %v3180_v18, %v3179_v17 }
 0xdef   : > { %4264 = vmatprep.subr.bf16.mxu1 %v4263_v22 }
 0xdf2   : > { %4266 = vmatpush3.bf16.msra.mxu1 %v4263_v22  ;;  %v4271_v22 = vpack.c.bf16 (!%p3654_p0), %v3182_v43, %v3181_v19 }
 0xdf3   : > { %4291 = vmatprep.subr.bf16.mxu1 (!%p3654_p0), %v4700_v20 }
 0xe73   : > { %v2888_v44 = vpop.xlane.xlu0 %2887 }
 0xe74   : > { %v2891_v45 = vmul.f32 0.03125, %v2888_v44  ;;  %v3651_v44 = vld [vmem:[%s870_s12] ss:$0 sm:$0xff] }
 0xe76   : > { %v2893_v46 = vadd.f32 1e-12, %v2891_v45 }
 0xe77   : > { %v2890_v47 = vpop.xlane.xlu0 %2889 }
 0xe78   : > { %4451 = vrsqrt.f32 %v2893_v46  ;;  %v2892_v53 = vmul.f32 0.03125, %v2890_v47 }
 0xe7a   : > { %v2894_v2 = vadd.f32 1e-12, %v2892_v53 }
 0xe7c   : > { %4453 = vrsqrt.f32 %v2894_v2 }
 0xe82   : > { %v4452_v48 = vpop.eup %4451 }
 0xe83   : > { %v2897_v56 = vmul.f32 %v4452_v48, %v2883_v25 }
 0xe85   : > { %v2905_v60 = vmul.f32 %v3648_v49, %v2897_v56 }
 0xe86   : > { %v4454_v51 = vpop.eup %4453 }
 0xe87   : > { %v2898_v52 = vmul.f32 %v4454_v51, %v2884_v26  ;;  %v5419_v54 = vadd.f32 %v3649_v50, %v2905_v60 }
 0xe89   : > { %v2906_v1 = vmul.f32 %v3648_v49, %v2898_v52  ;;  %3999 = vmatprep.mubr.f32.mxu0 %v5419_v54 }
 0xe8b   : > { %v5422_v62 = vadd.f32 %v3649_v50, %v2906_v1 }
 0xe8d   : > { %4000 = vmatmul.mubr.f32.vlgmr.msra.gmra.mrb[26].mxu0 %v5422_v62 }
 0xe8e   : > { %4069 = vmatprep.mubr.msk.f32.mxu0 (!%p3654_p0), %vm4701_vm4, %v4702_v57  ;;  %4269 = vmatpush3.bf16.msra.mxu0 (!%p3654_p0), %v4268_v21 }
 0xe8f   : > { %4270 = vmatprep.subr.bf16.mxu0 (!%p3654_p0), %v4700_v20 }
 0xe92   : > { %4272 = vmatpush3.bf16.msra.mxu0 (!%p3654_p0), %v4271_v22 }
 0xe93   : > { %4273 = vmatprep.subr.bf16.mxu0 (!%p3654_p0), %v4700_v20 }
 0xf60   : > { %v4001_v25 = vpop.f32.mrb[26].mxu0 }
 0xf61   : > { %v3010_v26 = vadd.f32 %v4001_v25, %v3650_v24  ;;  %v3004_v27 = vpop.f32.mrb[27].mxu0  ;;  %v3184_v25 = vld [vmem:[#allocation9 + $0x28] sm:$0xff] (!%p3654_p0) }
 0xf62   : > { %v3005_v28 = vadd.f32 %v3650_v24, %v3004_v27  ;;  %v3183_v24 = vld [vmem:[#allocation9 + $0x20] sm:$0xff] (!%p3654_p0)  ;;  %v3280_v27 = vld [vmem:[#allocation11 + $0x8] sm:$0xff] (!%p3654_p0) }
 0xf63   : > { %v3014_v29 = vmul.f32 %v3010_v26, %v3010_v26 }
 0xf64   : > { %v3013_v31 = vmul.f32 %v3005_v28, %v3005_v28 }
 0xf65   : > { %v3016_v32 = vmul.f32 %v3014_v29, %v3010_v26  ;;  %v3281_v29 = vld [vmem:[#allocation11 + $0x10] sm:$0xff] (!%p3654_p0) }
 0xf66   : > { %v3015_v33 = vmul.f32 %v3013_v31, %v3005_v28  ;;  %v3282_v31 = vld [vmem:[#allocation11 + $0x18] sm:$0xff] (!%p3654_p0) }
 0xf67   : > { %v3018_v34 = vmul.f32 0.044715, %v3016_v32  ;;  %v4274_v32 = vpack.c.bf16 (!%p3654_p0), %v3184_v25, %v3183_v24 }
 0xf68   : > { %v3017_v58 = vmul.f32 0.044715, %v3015_v33  ;;  %v3185_v33 = vld [vmem:[#allocation9 + $0x30] sm:$0xff] (!%p3654_p0) }
 0xf69   : > { %v3020_v35 = vadd.f32 %v3018_v34, %v3010_v26  ;;  %v3186_v34 = vld [vmem:[#allocation9 + $0x38] sm:$0xff] (!%p3654_p0)  ;;  %4275 = vmatpush3.bf16.msra.mxu0 (!%p3654_p0), %v4274_v32 }
 0xf6a   : > { %v3019_v38 = vadd.f32 %v3017_v58, %v3005_v28  ;;  %v4295_v58 = vpack.c.bf16 (!%p3654_p0), %v3282_v31, %v3281_v29  ;;  %4276 = vmatprep.subr.bf16.mxu0 (!%p3654_p0), %v4700_v20 }
 0xf6b   : > { %v3022_v36 = vmul.f32 0.7978846, %v3020_v35  ;;  %v3283_v35 = vld [vmem:[#allocation11 + $0x20] sm:$0xff] (!%p3654_p0) }
 0xf6c   : > { %v3021_v14 = vmul.f32 0.7978846, %v3019_v38  ;;  %v3284_v38 = vld [vmem:[#allocation11 + $0x28] sm:$0xff] (!%p3654_p0) }
 0xf6d   : > { %4455 = vtanh.f32 %v3022_v36  ;;  %v4277_v36 = vpack.c.bf16 (!%p3654_p0), %v3186_v34, %v3185_v33 }
 0xf6e   : > { %4457 = vtanh.f32 %v3021_v14  ;;  %v3187_v14 = vld [vmem:[#allocation9 + $0x40] sm:$0xff] (!%p3654_p0) }
 0xf6f   : > { %4278 = vmatpush3.bf16.msra.mxu0 (!%p3654_p0), %v4277_v36 }
 0xf70   : > { %4279 = vmatprep.subr.bf16.mxu0 (!%p3654_p0), %v4700_v20 }
 0xf77   : > { %v4456_v37 = vpop.eup %4455 }
 0xf78   : > { %v4458_v39 = vpop.eup %4457  ;;  %v3026_v40 = vadd.f32 1.0, %v4456_v37  ;;  %v3188_v37 = vld [vmem:[#allocation9 + $0x48] sm:$0xff] (!%p3654_p0) }
 0xf79   : > { %v3025_v10 = vadd.f32 1.0, %v4458_v39  ;;  %v4298_v39 = vpack.c.bf16 (!%p3654_p0), %v3284_v38, %v3283_v35 }
 0xf7a   : > { %v3028_v23 = vmul.f32 0.5, %v3026_v40  ;;  %v3285_v40 = vld [vmem:[#allocation11 + $0x30] sm:$0xff] (!%p3654_p0) }
 0xf7b   : > { %v3027_v41 = vmul.f32 0.5, %v3025_v10  ;;  %v3286_v10 = vld [vmem:[#allocation11 + $0x38] sm:$0xff] (!%p3654_p0) }
 0xf7c   : > { %v3030_v30 = vmul.f32 %v3028_v23, %v3010_v26  ;;  %v3279_v26 = vld [vmem:[#allocation11] sm:$0xff] (!%p3654_p0)  ;;  %v4280_v23 = vpack.c.bf16 (!%p3654_p0), %v3188_v37, %v3187_v14 }
 0xf7d   : > { %v3029_v42 = vmul.f32 %v3027_v41, %v3005_v28  ;;  %v4292_v28 = vpack.c.bf16 (!%p3654_p0), %v3280_v27, %v3279_v26  ;;  %v3189_v41 = vld [vmem:[#allocation9 + $0x50] sm:$0xff] (!%p3654_p0) }
 0xf7e   : > { %4281 = vmatpush3.bf16.msra.mxu0 (!%p3654_p0), %v4280_v23 }
 0xf7f   : > { %4034 = vmatprep.mubr.f32.mxu1 %v3029_v42  ;;  %v3190_v42 = vld [vmem:[#allocation9 + $0x58] sm:$0xff] (!%p3654_p0)  ;;  %4282 = vmatprep.subr.bf16.mxu0 (!%p3654_p0), %v4700_v20 }
 0xf80   : > { %4035 = vmatmul.mubr.f32.vlgmr.msra.gmra.mrb[14].mxu1 %v3030_v30  ;;  %v4301_v30 = vpack.c.bf16 (!%p3654_p0), %v3286_v10, %v3285_v40 }
 0xf81   : > { %4104 = vmatprep.mubr.msk.f32.mxu1 (!%p3654_p0), %vm4701_vm4, %v4702_v57  ;;  %4293 = vmatpush3.bf16.msra.mxu1 (!%p3654_p0), %v4292_v28 }
 0xf82   : > { %4294 = vmatprep.subr.bf16.mxu1 (!%p3654_p0), %v4700_v20 }
 0xf85   : > { %4296 = vmatpush3.bf16.msra.mxu1 (!%p3654_p0), %v4295_v58 }
 0xf86   : > { %4297 = vmatprep.subr.bf16.mxu1 (!%p3654_p0), %v4700_v20 }
 0xf89   : > { %4299 = vmatpush3.bf16.msra.mxu1 (!%p3654_p0), %v4298_v39 }
 0xf8a   : > { %4300 = vmatprep.subr.bf16.mxu1 (!%p3654_p0), %v4700_v20 }
 0xf8d   : > { %4302 = vmatpush3.bf16.msra.mxu1 (!%p3654_p0), %v4301_v30 }
 0xf8e   : > { %4303 = vmatprep.subr.bf16.mxu1 (!%p3654_p0), %v4700_v20 }
0x1053   : > { %v4036_v45 = vpop.f32.mrb[14].mxu1 }
0x1054   : > { %v3120_v46 = vpop.f32.mrb[15].mxu1  ;;  %v3126_v53 = vadd.f32 %v4036_v45, %v3651_v44  ;;  %v3288_v45 = vld [vmem:[#allocation11 + $0x48] sm:$0xff] (!%p3654_p0) }
0x1055   : > { %v3121_v47 = vadd.f32 %v3651_v44, %v3120_v46  ;;  %v3287_v44 = vld [vmem:[#allocation11 + $0x40] sm:$0xff] (!%p3654_p0)  ;;  %v4283_v46 = vpack.c.bf16 (!%p3654_p0), %v3190_v42, %v3189_v41 }
0x1056   : > { %v3130_v48 = vadd.f32 %v3126_v53, %v5422_v62  ;;  %v3192_v53 = vld [vmem:[#allocation9 + $0x68] sm:$0xff] (!%p3654_p0) }
0x1057   : > { %v3129_v2 = vadd.f32 %v3121_v47, %v5419_v54  ;;  %v3191_v47 = vld [vmem:[#allocation9 + $0x60] sm:$0xff] (!%p3654_p0)  ;;  %4284 = vmatpush3.bf16.msra.mxu0 (!%p3654_p0), %v4283_v46 }
0x1058   : > { %4285 = vmatprep.subr.bf16.mxu0 (!%p3654_p0), %v4700_v20 }
0x1059   : > { %3133 = vadd.xlane.f32.xlu0 %v3129_v2 }
0x105d   : > { %3135 = vadd.xlane.f32.xlu0 %v3130_v48 }
0x10e6   : > { %v3134_v49 = vpop.xlane.xlu0 %3133 }
0x10e7   : > { %v3137_v56 = vmul.f32 0.03125, %v3134_v49  ;;  %v3193_v49 = vld [vmem:[#allocation9 + $0x70] sm:$0xff] (!%p3654_p0) }
0x10e9   : > { %v3139_v50 = vsub.f32 %v3129_v2, %v3137_v56  ;;  %v4304_v2 = vpack.c.bf16 (!%p3654_p0), %v3288_v45, %v3287_v44  ;;  %v3194_v56 = vld [vmem:[#allocation9 + $0x78] sm:$0xff] (!%p3654_p0) }
0x10ea   : > { %v3136_v60 = vpop.xlane.xlu0 %3135 }
0x10eb   : > { %v3141_v51 = vmul.f32 %v5082_v3, %v3139_v50  ;;  %v3138_v52 = vmul.f32 0.03125, %v3136_v60  ;;  %4305 = vmatpush3.bf16.msra.mxu1 (!%p3654_p0), %v4304_v2  ;;  %v4289_v50 = vpack.c.bf16 (!%p3654_p0), %v3194_v56, %v3193_v49 }
0x10ec   : > { %4306 = vmatprep.subr.bf16.mxu1 (!%p3654_p0), %v4700_v20 }
0x10ed   : > { %v3140_v1 = vsub.f32 %v3130_v48, %v3138_v52  ;;  %v3143_v55 = vmul.f32 %v3141_v51, %v3141_v51  ;;  %v4286_v48 = vpack.c.bf16 (!%p3654_p0), %v3192_v53, %v3191_v47  ;;  %v3289_v52 = vld [vmem:[#allocation11 + $0x50] sm:$0xff] (!%p3654_p0) }
0x10ef   : > { %v3142_v0 = vmul.f32 %v5082_v3, %v3140_v1  ;;  %3145 = vadd.xlane.f32.xlu0 %v3143_v55  ;;  %v3653_v3 = vld [vmem:[%s876_s15] ss:$0 sm:$0xff]  ;;  %4287 = vmatpush3.bf16.msra.mxu0 (!%p3654_p0), %v4286_v48  ;;  %v3290_v1 = vld [vmem:[#allocation11 + $0x58] sm:$0xff] (!%p3654_p0)  ;;  %s5636_s15 = sld [smem:[#allocation36_spill]] (!%p3654_p0) }
0x10f0   : > { %4288 = vmatprep.subr.bf16.mxu0 (!%p3654_p0), %v4700_v20  ;;  %v4307_v55 = vpack.c.bf16 (!%p3654_p0), %v3290_v1, %v3289_v52 }
0x10f1   : > { %v3144_v59 = vmul.f32 %v3142_v0, %v3142_v0 }
0x10f2   : > { %4308 = vmatpush3.bf16.msra.mxu1 (!%p3654_p0), %v4307_v55 }
0x10f3   : > { %3147 = vadd.xlane.f32.xlu1 %v3144_v59  ;;  %4290 = vmatpush3.bf16.msra.mxu0 (!%p3654_p0), %v4289_v50  ;;  %v3292_v59 = vld [vmem:[#allocation11 + $0x68] sm:$0xff] (!%p3654_p0) }
0x10f4   : > { %4309 = vmatprep.subr.bf16.mxu1 (!%p3654_p0), %v4700_v20 }
0x117c   : > { %v3146_v54 = vpop.xlane.xlu0 %3145 }
0x117d   : > { %v3149_v61 = vmul.f32 0.03125, %v3146_v54 }
0x117f   : > { %v3151_v62 = vadd.f32 1e-12, %v3149_v61  ;;  %v3293_v61 = vld [vmem:[#allocation11 + $0x70] sm:$0xff] (!%p3654_p0) }
0x1180   : > { %v3148_v63 = vpop.xlane.xlu1 %3147 }
0x1181   : > { %4459 = vrsqrt.f32 %v3151_v62  ;;  %v3150_v4 = vmul.f32 0.03125, %v3148_v63  ;;  %v3294_v62 = vld [vmem:[#allocation11 + $0x78] sm:$0xff] (!%p3654_p0) }
0x1182   : > { %v4313_v63 = vpack.c.bf16 (!%p3654_p0), %v3294_v62, %v3293_v61 }
0x1183   : > { %v3152_v5 = vadd.f32 1e-12, %v3150_v4  ;;  %v3655_v4 = vld [vmem:[%s5636_s15] ss:$0 sm:$0xff] (!%p3654_p0) }
0x1185   : > { %4461 = vrsqrt.f32 %v3152_v5 }
0x118b   : > { %v4460_v6 = vpop.eup %4459 }
0x118c   : > { %v3155_v8 = vmul.f32 %v4460_v6, %v3141_v51 }
0x118e   : > { %v3163_v9 = vmul.f32 %v3652_v7, %v3155_v8 }
0x118f   : > { %v4462_v11 = vpop.eup %4461 }
0x1190   : > { %v5465_v12 = vadd.f32 %v3653_v3, %v3163_v9  ;;  %v3156_v13 = vmul.f32 %v4462_v11, %v3142_v0  ;;  %3178 = sbr.rel (%p3654_p0) target bundleno = 4945 (0x1351), region = 128  ;;  %v3291_v0 = vld [vmem:[#allocation11 + $0x60] sm:$0xff] (!%p3654_p0) }
0x1191   : > { %v4310_v54 = vpack.c.bf16 (!%p3654_p0), %v3292_v59, %v3291_v0 }
0x1192   : > { %3173 = vst [vmem:[#allocation2] sm:$0xff] %v5465_v12  ;;  %v3164_v15 = vmul.f32 %v3652_v7, %v3156_v13 }
0x1193   : > { %4311 = vmatpush3.bf16.msra.mxu1 (!%p3654_p0), %v4310_v54 }
0x1194   : > { %v5468_v16 = vadd.f32 %v3653_v3, %v3164_v15  ;;  %4312 = vmatprep.subr.bf16.mxu1 (!%p3654_p0), %v4700_v20  ;;  %v3656_v3 = vld [vmem:[%s5637_s1] ss:$0 sm:$0xff] (!%p3654_p0) }
0x1196   : > { %3174 = vst [vmem:[#allocation2 + $0x8] sm:$0xff] %v5468_v16  ;;  %v3204_v60 = vrot.slane (!%p3654_p0), %v5468_v16, 7 }
0x1197   : > { %4314 = vmatpush3.bf16.msra.mxu1 %v4313_v63 }
0x1198   : > { %v3206_v51 = vsel %vm3205_vm5, %v3204_v60, %v5465_v12 }
0x1199   : > { %4070 = vmatmul.mubr.f32.vlgmr.msra.gmra.mrb[0].mxu0 %v3206_v51 }
0x126c   : > { %v3274_v5 = vpop.f32.mrb[0].mxu0 }
0x126d   : > { %v3275_v6 = vadd.f32 %v3655_v4, %v3274_v5  ;;  %v4071_v7 = vpop.f32.mrb[1].mxu0 }
0x126f   : > { %4463 = vtanh.f32 %v3275_v6 }
0x1279   : > { %v4464_v8 = vpop.eup %4463 }
0x127a   : > { %4105 = vmatmul.mubr.f32.vlgmr.msra.gmra.mrb[0].mxu1 %v4464_v8 }
0x134d   : > { %v3368_v9 = vpop.f32.mrb[0].mxu1 }
0x134e   : > { %v3369_v11 = vadd.f32 %v3656_v3, %v3368_v9  ;;  %v4106_v12 = vpop.f32.mrb[1].mxu1 }
0x1350   : > { %3372 = vst [vmem:[#allocation12] sm:$0x3] %v3369_v11 }
0x1351 PF: > { %p4365_p8 = scmp.eq.s32.totalorder %s4828_s2, 1  ;;  %s4703_s13 = smov [#allocation12]  }
0x1352   : > { %s3380_s23 = sshll.u32 %s4703_s13, 4  ;;  %s3381_s23 = int_to_ptr.vmem [resolvable:$true] %s3380_s23 }
0x1353   : > { %s4611_s14 = scalar_lea.vmem %s3381_s23, 32  ;;  %p4618_p7 = scmp.lt.s32.totalorder %s3381_s23, %s3381_s23 }
0x1354   : > { %p4612_p12 = scmp.ne.s32.totalorder %s3381_s23, %s4611_s14  ;;  %p4619_p13 = scmp.lt.s32.totalorder %s4611_s14, %s4611_s14 }
0x1356   : > { %p4613_p6 = pnand %p4612_p12, %p4365_p8  ;;  %p4620_p5 = por %p4619_p13, %p4618_p7 }
0x1358   : > { %p4614_p4 = pneg %p4613_p6 }
0x135a   : > { %p4621_p9 = pnand %p4620_p5, %p4614_p4 }
0x135c   : > { %4624 = shalt.err (!%p4621_p9)
}
0x135d   : > { %s5638_s21 = sld [smem:[#allocation39_spill]] }
0x1363   : > { %s4625_s28 = scalar_lea.hbm %s5638_s21, 32 }
0x1364   : > { %p4626_p11 = scmp.ne.s32.totalorder %s5638_s21, %s4625_s28  ;;  %p4631_p1 = scmp.lt.u32.totalorder %s4625_s28, %s5638_s21 }
0x1366   : > { %p4627_p2 = pnand %p4626_p11, %p4365_p8 }
0x1368   : > { %p4628_p10 = pneg %p4627_p2 }
0x136a   : > { %p4633_p3 = pnand %p4631_p1, %p4628_p10 }
0x136c   : > { %4636 = shalt.err (!%p4633_p3)
}
0x136d   : > { %4340 = dma.vmem_to_hbm [thread:$0]  (%p4365_p8), %s3381_s23, 32, %s5638_s21, [#allocation5]  }
0x136e   : > { %4666 = dma.done.wait (%p4365_p8), [#allocation5], 32  }
0x136f   : > { %4668 = vsyncadd (%p4365_p8), [#allocation5], 4294967264 }
0x1370 PF: > { %s5639_s24 = sld [smem:[#allocation18_spill]]  ;;  %s5640_s5 = sld [smem:[#allocation17_spill]] }
0x1371   : > { %s5641_s23 = sld [smem:[#allocation19_spill]]  ;;  %s5642_s1 = smov %s4675_s22 }
0x1376   : > { %p35_p0 = scmp.ge.s32.totalorder %s5639_s24, 4   ;;  %s5643_s22 = smov %s5640_s5 }
0x1378   :  { %37 = sbr.rel (!%p35_p0) target bundleno = 28 (0x1c), region = 207 }
0x137f   :  { %3393 = vsyncpa [#allocation4], 1 }
0x1380   :  { %3395 = vsyncpa [#allocation4 + $0x1], 1 }
0x1381   :  { %3396 = vsyncpa [#allocation7], 1 }
0x1382   :  { %3398 = vsyncpa [#allocation7 + $0x1], 1 }
0x1383   :  { %3399 = vsyncpa [#allocation10], 1 }
0x1384   :  { %3400 = vsyncpa [#allocation5], 1 }
0x1385   :  { %3402 = vsyncpa [#allocation5 + $0x1], 1 }

</bundles_post_ra>
